<compile_context>
chip_gen: v7x
topology: tpu7x:2x2x1
jax: 0.10.0
libtpu: 0.0.40
codegen_flags: <defaults>
</compile_context>

<pallas_src>
import functools

import jax
import jax.numpy as jnp
import numpy as np
from jax.experimental import pallas as pl
from jax.experimental.pallas import tpu as pltpu


def _round_up(x, m):
    return (x + m - 1) // m * m


# ------------------------------ fused kernel -------------------------------

def _fused_cnn_kernel(*refs, num_conv, n_mlp, batch, n, f, conv_dims, g):
    """Whole CNN forward in a single kernel invocation.

    Ref order:
      refs[0]                    : x        (H0*N, Cin0)  N = W*B, row = (h*W + w)*B + b
      refs[1+2i], refs[2+2i]     : conv w_i (k, Cin, Cout)  (BN scale pre-folded)
                                   conv b_i (1, Cout)        (BN bias)
      refs[1+2*num_conv]         : slopes   (num_conv,)  SMEM  (PReLU slopes)
      next 2*n_mlp refs          : MLP layer 0: (G, C_last, Hpad), (1, Hpad)
                                   MLP layer i: (Hpad_in, Hpad_out), (1, Hpad_out)
      refs[-2]                   : out      (B, out_size)
      refs[-1]                   : scratch  (G*B, C_last) VMEM
    """
    x_ref = refs[0]
    conv_refs = refs[1:1 + 2 * num_conv]
    slopes_ref = refs[1 + 2 * num_conv]
    mlp_refs = refs[2 + 2 * num_conv:2 + 2 * num_conv + 2 * n_mlp]
    o_ref = refs[2 + 2 * num_conv + 2 * n_mlp]
    flat_ref = refs[3 + 2 * num_conv + 2 * n_mlp]

    act = x_ref[...]                                   # (H0*N, Cin0)
    for i in range(num_conv):
        k, cin, cout, h_in = conv_dims[i]
        hc = h_in - k + 1
        h_out = hc // f
        w_ref = conv_refs[2 * i]                       # (k, cin, cout)
        bias = conv_refs[2 * i + 1][...]               # (1, cout)

        # Conv (k,1): k matmuls over contiguous, 8-row-aligned H-shifted slices.
        acc = None
        for dk in range(k):
            part = jnp.dot(act[dk * n:dk * n + hc * n, :], w_ref[dk],
                           preferred_element_type=jnp.float32)
            acc = part if acc is None else acc + part
        y = acc + bias                                 # BatchNorm (scale folded)

        # MaxPool((f,1)): regroup rows (lane dim untouched) and reduce.
        z = y[:h_out * f * n].reshape(h_out, f * n, cout)
        pooled = z[:, 0:n, :]
        for p in range(1, f):
            pooled = jnp.maximum(pooled, z[:, p * n:(p + 1) * n, :])

        # PReLU (single learnable scalar per block, read from SMEM).
        a = slopes_ref[i]
        pooled = jnp.where(pooled >= 0, pooled, a * pooled)
        act = pooled.reshape(h_out * n, cout)

    # ----------------------- MLP head (dropout = identity) -----------------
    # torch.flatten(NCHW, 1) is folded into the first MLP weight's row
    # permutation/grouping: out1 = sum_g act[rows of group g] @ w0[g].
    flat_ref[...] = act                                # (G*B, C_last)
    w0_ref, b0_ref = mlp_refs[0], mlp_refs[1]
    h = None
    for grp in range(g):
        part = jnp.dot(flat_ref[grp * batch:(grp + 1) * batch, :], w0_ref[grp],
                       preferred_element_type=jnp.float32)
        h = part if h is None else h + part
    h = h + b0_ref[...]
    if n_mlp > 1:
        h = jnp.maximum(h, 0.0)
    for li in range(1, n_mlp):
        w_ref = mlp_refs[2 * li]
        b_ref = mlp_refs[2 * li + 1]
        h = jnp.dot(h, w_ref[...], preferred_element_type=jnp.float32) + b_ref[...]
        if li < n_mlp - 1:
            h = jnp.maximum(h, 0.0)
    o_ref[...] = h


# ------------------------- parameter preparation ---------------------------

def prepare_kernel_params(params, window_size, num_features):
    """Fold BN into conv weights, permute/pad MLP weights, build static config."""
    blocks = params["conv_blocks"]
    f = blocks[0]["f"]
    conv_args = []
    conv_dims = []
    h_in = window_size
    for blk in blocks:
        k = blk["k"]
        w = blk["w"]                                   # (k, cin, cout)
        cin, cout = w.shape[1], w.shape[2]
        scale = blk["bn_scale"].reshape(-1)
        w_folded = (w * scale[None, None, :]).astype(jnp.float32)
        conv_args += [w_folded, blk["bn_bias"].reshape(1, cout)]
        conv_dims.append((k, cin, cout, h_in))
        h_in = (h_in - k + 1) // f
    h_last = h_in
    c_last = blocks[-1]["w"].shape[2]
    slopes = jnp.concatenate(
        [blk["prelu_a"].reshape(1) for blk in blocks]).astype(jnp.float32)

    mlp = params["mlp"]
    n_mlp = len(mlp)
    g = h_last * num_features
    w0, b0 = mlp[0]
    d0_in, d0_out = w0.shape
    assert d0_in == c_last * h_last * num_features
    pad0 = _round_up(d0_out, 128) if n_mlp > 1 else d0_out
    # torch flatten order is (c, h, w); kernel row-group order is g = h*W + w.
    w0p = w0.reshape(c_last, h_last, num_features, d0_out)
    w0p = jnp.transpose(w0p, (1, 2, 0, 3)).reshape(g, c_last, d0_out)
    w0p = jnp.pad(w0p, ((0, 0), (0, 0), (0, pad0 - d0_out)))
    b0p = jnp.pad(b0, ((0, 0), (0, pad0 - d0_out)))
    mlp_args = [w0p, b0p]
    prev_pad = pad0
    for li in range(1, n_mlp):
        w, bm = mlp[li]
        din, dout = w.shape
        dpad = _round_up(dout, 128) if li < n_mlp - 1 else dout
        wp = jnp.pad(w, ((0, prev_pad - din), (0, dpad - dout)))
        bp = jnp.pad(bm, ((0, 0), (0, dpad - dout)))
        mlp_args += [wp, bp]
        prev_pad = dpad

    static = dict(num_conv=len(blocks), n_mlp=n_mlp, f=f,
                  conv_dims=tuple(conv_dims), g=g, c_last=c_last,
                  out_size=mlp[-1][0].shape[1])
    return dict(conv_args=conv_args, slopes=slopes, mlp_args=mlp_args), static


# ------------------------------ model wrapper -------------------------------

def cnn_forward(x_nchw, kparams, static):
    b, c0, h0, w_feat = x_nchw.shape
    n = w_feat * b
    # NCHW -> rows ordered (h, w, b), channels on lanes.
    x2d = jnp.transpose(x_nchw, (2, 3, 0, 1)).reshape(h0 * n, c0)

    conv_args = kparams["conv_args"]
    mlp_args = kparams["mlp_args"]
    args = [x2d] + list(conv_args) + [kparams["slopes"]] + list(mlp_args)

    vmem = pl.BlockSpec(memory_space=pltpu.MemorySpace.VMEM)
    smem = pl.BlockSpec(memory_space=pltpu.MemorySpace.SMEM)
    in_specs = [vmem] * (1 + len(conv_args)) + [smem] + [vmem] * len(mlp_args)

    kernel = functools.partial(
        _fused_cnn_kernel,
        num_conv=static["num_conv"], n_mlp=static["n_mlp"], batch=b, n=n,
        f=static["f"], conv_dims=static["conv_dims"], g=static["g"])

    return pl.pallas_call(
        kernel,
        out_shape=jax.ShapeDtypeStruct((b, static["out_size"]), jnp.float32),
        in_specs=in_specs,
        out_specs=vmem,
        scratch_shapes=[pltpu.VMEM((static["g"] * b, static["c_last"]),
                                   jnp.float32)],
    )(*args)


# ------------------------------ parameters ----------------------------------

def init_params(key, window_size, num_features, output_size=1, num_conv=3,
                kernel_size=3, channels=2, num_hidden_layers=2,
                hidden_size=100):
    k = kernel_size
    q = channels
    f = 2
    eps = 1e-5
    out_size = window_size
    cin = 1
    blocks = []
    for _ in range(num_conv):
        cout = q * f
        key, k1, k2, k3 = jax.random.split(key, 4)
        w = jax.random.normal(k1, (k, cin, cout), jnp.float32) / np.sqrt(k * cin)
        gamma = 1.0 + 0.1 * jax.random.normal(k2, (cout,), jnp.float32)
        beta = 0.1 * jax.random.normal(k3, (cout,), jnp.float32)
        run_mean = jnp.zeros((cout,), jnp.float32)
        run_var = jnp.ones((cout,), jnp.float32)
        scale = gamma / jnp.sqrt(run_var + eps)
        bias = beta - run_mean * scale
        blocks.append(dict(
            w=w,
            bn_scale=scale.reshape(1, cout),
            bn_bias=bias.reshape(1, cout),
            prelu_a=jnp.full((1, 1), 0.25, jnp.float32),   # PReLU default init
            k=k, f=f,
        ))
        out_size = (out_size - k + 1) // f
        cin = cout
        q = cout
    flat_size = num_features * q * out_size
    # TODO(synk): BaseMLP definition is not provided; assumed the standard
    # [Linear -> ReLU -> Dropout] x num_hidden_layers followed by a Linear head.
    dims = [flat_size] + [hidden_size] * num_hidden_layers + [output_size]
    mlp = []
    for din, dout in zip(dims[:-1], dims[1:]):
        key, k1, k2 = jax.random.split(key, 3)
        wm = jax.random.normal(k1, (din, dout), jnp.float32) / np.sqrt(din)
        bm = 0.01 * jax.random.normal(k2, (1, dout), jnp.float32)
        mlp.append((wm, bm))
    return dict(conv_blocks=blocks, mlp=mlp), flat_size


# ------------------------- pure-JAX reference ------------------------------

def reference_forward(x_nchw, params):
    b = x_nchw.shape[0]
    cur = x_nchw
    for blk in params["conv_blocks"]:
        k, f = blk["k"], blk["f"]
        w = blk["w"]                                   # (k, cin, cout)
        h_in = cur.shape[2]
        h_conv = h_in - k + 1
        acc = 0.0
        for dk in range(k):
            acc = acc + jnp.einsum('bchw,cd->bdhw',
                                   cur[:, :, dk:dk + h_conv, :], w[dk])
        y = (acc * blk["bn_scale"].reshape(1, -1, 1, 1)
             + blk["bn_bias"].reshape(1, -1, 1, 1))
        h_out = h_conv // f
        y = y[:, :, :h_out * f, :].reshape(b, y.shape[1], h_out, f, y.shape[3])
        y = jnp.max(y, axis=3)
        a = blk["prelu_a"][0, 0]
        cur = jnp.maximum(y, 0.0) + a * jnp.minimum(y, 0.0)
    cur = cur.reshape(b, -1)
    n_layers = len(params["mlp"])
    for i, (wm, bm) in enumerate(params["mlp"]):
        cur = cur @ wm + bm
        if i < n_layers - 1:
            cur = jnp.maximum(cur, 0.0)
    return cur


# --------------------------------- main -------------------------------------

if __name__ == "__main__":
    window_size = 32
    num_features = 4
    batch = 2

    key = jax.random.PRNGKey(0)
    key, xkey = jax.random.split(key)
    x = jax.random.normal(xkey, (batch, 1, window_size, num_features),
                          jnp.float32)
    params, flat_size = init_params(key, window_size, num_features)
    kparams, static = prepare_kernel_params(params, window_size, num_features)

    out = cnn_forward(x, kparams, static)
    out = jax.block_until_ready(out)

    ref = reference_forward(x, params)
    np.testing.assert_allclose(np.asarray(out), np.asarray(ref),
                               rtol=1e-4, atol=1e-4)
    assert out.shape == (batch, 1)
    print("KERNEL_OK")
</pallas_src>

<mosaic_0001>
module attributes {stable_mosaic.version = 11 : i64} {
  func.func @_fused_cnn_kernel(%arg0: memref<256x1xf32, #tpu.memory_space<vmem>>, %arg1: memref<3x1x4xf32, #tpu.memory_space<vmem>>, %arg2: memref<1x4xf32, #tpu.memory_space<vmem>>, %arg3: memref<3x4x8xf32, #tpu.memory_space<vmem>>, %arg4: memref<1x8xf32, #tpu.memory_space<vmem>>, %arg5: memref<3x8x16xf32, #tpu.memory_space<vmem>>, %arg6: memref<1x16xf32, #tpu.memory_space<vmem>>, %arg7: memref<3xf32, #tpu.memory_space<smem>>, %arg8: memref<8x16x128xf32, #tpu.memory_space<vmem>>, %arg9: memref<1x128xf32, #tpu.memory_space<vmem>>, %arg10: memref<128x128xf32, #tpu.memory_space<vmem>>, %arg11: memref<1x128xf32, #tpu.memory_space<vmem>>, %arg12: memref<128x1xf32, #tpu.memory_space<vmem>>, %arg13: memref<1x1xf32, #tpu.memory_space<vmem>>, %arg14: memref<2x1xf32, #tpu.memory_space<vmem>>, %arg15: memref<16x16xf32, #tpu.memory_space<vmem>>) attributes {dimension_semantics = [], scalar_prefetch = 0 : i64, scratch_operands = 1 : i64, tpu.core_type = #tpu.core_type<tc>} {
    %c0 = arith.constant 0 : index
    %c0_0 = arith.constant 0 : index
    %0 = vector.load %arg0[%c0, %c0_0] : memref<256x1xf32, #tpu.memory_space<vmem>>, vector<256x1xf32>
    %c0_1 = arith.constant 0 : index
    %c0_2 = arith.constant 0 : index
    %1 = vector.load %arg2[%c0_1, %c0_2] : memref<1x4xf32, #tpu.memory_space<vmem>>, vector<1x4xf32>
    %2 = vector.extract_strided_slice %0 {offsets = [0, 0], sizes = [240, 1], strides = [1, 1]} : vector<256x1xf32> to vector<240x1xf32>
    %c0_3 = arith.constant 0 : index
    %c0_4 = arith.constant 0 : index
    %c0_5 = arith.constant 0 : index
    %3 = vector.load %arg1[%c0_3, %c0_4, %c0_5] : memref<3x1x4xf32, #tpu.memory_space<vmem>>, vector<1x1x4xf32>
    %4 = vector.shape_cast %3 : vector<1x1x4xf32> to vector<1x4xf32>
    %cst = arith.constant dense<0.000000e+00> : vector<240x4xf32>
    %5 = tpu.matmul %2, %4, %cst {dimension_numbers = #tpu.dot_dimension_numbers<[1], [0], [0], [1], [0, 0, 1, 1], [], []>} : vector<240x1xf32>, vector<1x4xf32>, vector<240x4xf32> -> vector<240x4xf32>
    %6 = vector.extract_strided_slice %0 {offsets = [8, 0], sizes = [240, 1], strides = [1, 1]} : vector<256x1xf32> to vector<240x1xf32>
    %c1 = arith.constant 1 : index
    %c0_6 = arith.constant 0 : index
    %c0_7 = arith.constant 0 : index
    %7 = vector.load %arg1[%c1, %c0_6, %c0_7] : memref<3x1x4xf32, #tpu.memory_space<vmem>>, vector<1x1x4xf32>
    %8 = vector.shape_cast %7 : vector<1x1x4xf32> to vector<1x4xf32>
    %cst_8 = arith.constant dense<0.000000e+00> : vector<240x4xf32>
    %9 = tpu.matmul %6, %8, %cst_8 {dimension_numbers = #tpu.dot_dimension_numbers<[1], [0], [0], [1], [0, 0, 1, 1], [], []>} : vector<240x1xf32>, vector<1x4xf32>, vector<240x4xf32> -> vector<240x4xf32>
    %10 = arith.addf %5, %9 : vector<240x4xf32>
    %11 = vector.extract_strided_slice %0 {offsets = [16, 0], sizes = [240, 1], strides = [1, 1]} : vector<256x1xf32> to vector<240x1xf32>
    %c2 = arith.constant 2 : index
    %c0_9 = arith.constant 0 : index
    %c0_10 = arith.constant 0 : index
    %12 = vector.load %arg1[%c2, %c0_9, %c0_10] : memref<3x1x4xf32, #tpu.memory_space<vmem>>, vector<1x1x4xf32>
    %13 = vector.shape_cast %12 : vector<1x1x4xf32> to vector<1x4xf32>
    %cst_11 = arith.constant dense<0.000000e+00> : vector<240x4xf32>
    %14 = tpu.matmul %11, %13, %cst_11 {dimension_numbers = #tpu.dot_dimension_numbers<[1], [0], [0], [1], [0, 0, 1, 1], [], []>} : vector<240x1xf32>, vector<1x4xf32>, vector<240x4xf32> -> vector<240x4xf32>
    %15 = arith.addf %10, %14 : vector<240x4xf32>
    %16 = vector.broadcast %1 : vector<1x4xf32> to vector<240x4xf32>
    %17 = arith.addf %15, %16 : vector<240x4xf32>
    %18 = vector.shape_cast %17 : vector<240x4xf32> to vector<15x16x4xf32>
    %19 = vector.extract_strided_slice %18 {offsets = [0, 0, 0], sizes = [15, 8, 4], strides = [1, 1, 1]} : vector<15x16x4xf32> to vector<15x8x4xf32>
    %20 = vector.extract_strided_slice %18 {offsets = [0, 8, 0], sizes = [15, 8, 4], strides = [1, 1, 1]} : vector<15x16x4xf32> to vector<15x8x4xf32>
    %21 = arith.maximumf %19, %20 : vector<15x8x4xf32>
    %c0_12 = arith.constant 0 : index
    %22 = memref.load %arg7[%c0_12] : memref<3xf32, #tpu.memory_space<smem>>
    %cst_13 = arith.constant 0.000000e+00 : f32
    %23 = vector.broadcast %cst_13 : f32 to vector<15x8x4xf32>
    %24 = arith.cmpf oge, %21, %23 : vector<15x8x4xf32>
    %25 = vector.broadcast %22 : f32 to vector<15x8x4xf32>
    %26 = arith.mulf %25, %21 : vector<15x8x4xf32>
    %27 = arith.select %24, %21, %26 : vector<15x8x4xi1>, vector<15x8x4xf32>
    %28 = vector.shape_cast %27 : vector<15x8x4xf32> to vector<120x4xf32>
    %c0_14 = arith.constant 0 : index
    %c0_15 = arith.constant 0 : index
    %29 = vector.load %arg4[%c0_14, %c0_15] : memref<1x8xf32, #tpu.memory_space<vmem>>, vector<1x8xf32>
    %30 = vector.extract_strided_slice %28 {offsets = [0, 0], sizes = [104, 4], strides = [1, 1]} : vector<120x4xf32> to vector<104x4xf32>
    %c0_16 = arith.constant 0 : index
    %c0_17 = arith.constant 0 : index
    %c0_18 = arith.constant 0 : index
    %31 = vector.load %arg3[%c0_16, %c0_17, %c0_18] : memref<3x4x8xf32, #tpu.memory_space<vmem>>, vector<1x4x8xf32>
    %32 = vector.shape_cast %31 : vector<1x4x8xf32> to vector<4x8xf32>
    %cst_19 = arith.constant dense<0.000000e+00> : vector<104x8xf32>
    %33 = tpu.matmul %30, %32, %cst_19 {dimension_numbers = #tpu.dot_dimension_numbers<[1], [0], [0], [1], [0, 0, 1, 1], [], []>} : vector<104x4xf32>, vector<4x8xf32>, vector<104x8xf32> -> vector<104x8xf32>
    %34 = vector.extract_strided_slice %28 {offsets = [8, 0], sizes = [104, 4], strides = [1, 1]} : vector<120x4xf32> to vector<104x4xf32>
    %c1_20 = arith.constant 1 : index
    %c0_21 = arith.constant 0 : index
    %c0_22 = arith.constant 0 : index
    %35 = vector.load %arg3[%c1_20, %c0_21, %c0_22] : memref<3x4x8xf32, #tpu.memory_space<vmem>>, vector<1x4x8xf32>
    %36 = vector.shape_cast %35 : vector<1x4x8xf32> to vector<4x8xf32>
    %cst_23 = arith.constant dense<0.000000e+00> : vector<104x8xf32>
    %37 = tpu.matmul %34, %36, %cst_23 {dimension_numbers = #tpu.dot_dimension_numbers<[1], [0], [0], [1], [0, 0, 1, 1], [], []>} : vector<104x4xf32>, vector<4x8xf32>, vector<104x8xf32> -> vector<104x8xf32>
    %38 = arith.addf %33, %37 : vector<104x8xf32>
    %39 = vector.extract_strided_slice %28 {offsets = [16, 0], sizes = [104, 4], strides = [1, 1]} : vector<120x4xf32> to vector<104x4xf32>
    %c2_24 = arith.constant 2 : index
    %c0_25 = arith.constant 0 : index
    %c0_26 = arith.constant 0 : index
    %40 = vector.load %arg3[%c2_24, %c0_25, %c0_26] : memref<3x4x8xf32, #tpu.memory_space<vmem>>, vector<1x4x8xf32>
    %41 = vector.shape_cast %40 : vector<1x4x8xf32> to vector<4x8xf32>
    %cst_27 = arith.constant dense<0.000000e+00> : vector<104x8xf32>
    %42 = tpu.matmul %39, %41, %cst_27 {dimension_numbers = #tpu.dot_dimension_numbers<[1], [0], [0], [1], [0, 0, 1, 1], [], []>} : vector<104x4xf32>, vector<4x8xf32>, vector<104x8xf32> -> vector<104x8xf32>
    %43 = arith.addf %38, %42 : vector<104x8xf32>
    %44 = vector.broadcast %29 : vector<1x8xf32> to vector<104x8xf32>
    %45 = arith.addf %43, %44 : vector<104x8xf32>
    %46 = vector.extract_strided_slice %45 {offsets = [0, 0], sizes = [96, 8], strides = [1, 1]} : vector<104x8xf32> to vector<96x8xf32>
    %47 = vector.shape_cast %46 : vector<96x8xf32> to vector<6x16x8xf32>
    %48 = vector.extract_strided_slice %47 {offsets = [0, 0, 0], sizes = [6, 8, 8], strides = [1, 1, 1]} : vector<6x16x8xf32> to vector<6x8x8xf32>
    %49 = vector.extract_strided_slice %47 {offsets = [0, 8, 0], sizes = [6, 8, 8], strides = [1, 1, 1]} : vector<6x16x8xf32> to vector<6x8x8xf32>
    %50 = arith.maximumf %48, %49 : vector<6x8x8xf32>
    %c1_28 = arith.constant 1 : index
    %51 = memref.load %arg7[%c1_28] : memref<3xf32, #tpu.memory_space<smem>>
    %cst_29 = arith.constant 0.000000e+00 : f32
    %52 = vector.broadcast %cst_29 : f32 to vector<6x8x8xf32>
    %53 = arith.cmpf oge, %50, %52 : vector<6x8x8xf32>
    %54 = vector.broadcast %51 : f32 to vector<6x8x8xf32>
    %55 = arith.mulf %54, %50 : vector<6x8x8xf32>
    %56 = arith.select %53, %50, %55 : vector<6x8x8xi1>, vector<6x8x8xf32>
    %57 = vector.shape_cast %56 : vector<6x8x8xf32> to vector<48x8xf32>
    %c0_30 = arith.constant 0 : index
    %c0_31 = arith.constant 0 : index
    %58 = vector.load %arg6[%c0_30, %c0_31] : memref<1x16xf32, #tpu.memory_space<vmem>>, vector<1x16xf32>
    %59 = vector.extract_strided_slice %57 {offsets = [0, 0], sizes = [32, 8], strides = [1, 1]} : vector<48x8xf32> to vector<32x8xf32>
    %c0_32 = arith.constant 0 : index
    %c0_33 = arith.constant 0 : index
    %c0_34 = arith.constant 0 : index
    %60 = vector.load %arg5[%c0_32, %c0_33, %c0_34] : memref<3x8x16xf32, #tpu.memory_space<vmem>>, vector<1x8x16xf32>
    %61 = vector.shape_cast %60 : vector<1x8x16xf32> to vector<8x16xf32>
    %cst_35 = arith.constant dense<0.000000e+00> : vector<32x16xf32>
    %62 = tpu.matmul %59, %61, %cst_35 {dimension_numbers = #tpu.dot_dimension_numbers<[1], [0], [0], [1], [0, 0, 1, 1], [], []>} : vector<32x8xf32>, vector<8x16xf32>, vector<32x16xf32> -> vector<32x16xf32>
    %63 = vector.extract_strided_slice %57 {offsets = [8, 0], sizes = [32, 8], strides = [1, 1]} : vector<48x8xf32> to vector<32x8xf32>
    %c1_36 = arith.constant 1 : index
    %c0_37 = arith.constant 0 : index
    %c0_38 = arith.constant 0 : index
    %64 = vector.load %arg5[%c1_36, %c0_37, %c0_38] : memref<3x8x16xf32, #tpu.memory_space<vmem>>, vector<1x8x16xf32>
    %65 = vector.shape_cast %64 : vector<1x8x16xf32> to vector<8x16xf32>
    %cst_39 = arith.constant dense<0.000000e+00> : vector<32x16xf32>
    %66 = tpu.matmul %63, %65, %cst_39 {dimension_numbers = #tpu.dot_dimension_numbers<[1], [0], [0], [1], [0, 0, 1, 1], [], []>} : vector<32x8xf32>, vector<8x16xf32>, vector<32x16xf32> -> vector<32x16xf32>
    %67 = arith.addf %62, %66 : vector<32x16xf32>
    %68 = vector.extract_strided_slice %57 {offsets = [16, 0], sizes = [32, 8], strides = [1, 1]} : vector<48x8xf32> to vector<32x8xf32>
    %c2_40 = arith.constant 2 : index
    %c0_41 = arith.constant 0 : index
    %c0_42 = arith.constant 0 : index
    %69 = vector.load %arg5[%c2_40, %c0_41, %c0_42] : memref<3x8x16xf32, #tpu.memory_space<vmem>>, vector<1x8x16xf32>
    %70 = vector.shape_cast %69 : vector<1x8x16xf32> to vector<8x16xf32>
    %cst_43 = arith.constant dense<0.000000e+00> : vector<32x16xf32>
    %71 = tpu.matmul %68, %70, %cst_43 {dimension_numbers = #tpu.dot_dimension_numbers<[1], [0], [0], [1], [0, 0, 1, 1], [], []>} : vector<32x8xf32>, vector<8x16xf32>, vector<32x16xf32> -> vector<32x16xf32>
    %72 = arith.addf %67, %71 : vector<32x16xf32>
    %73 = vector.broadcast %58 : vector<1x16xf32> to vector<32x16xf32>
    %74 = arith.addf %72, %73 : vector<32x16xf32>
    %75 = vector.shape_cast %74 : vector<32x16xf32> to vector<2x16x16xf32>
    %76 = vector.extract_strided_slice %75 {offsets = [0, 0, 0], sizes = [2, 8, 16], strides = [1, 1, 1]} : vector<2x16x16xf32> to vector<2x8x16xf32>
    %77 = vector.extract_strided_slice %75 {offsets = [0, 8, 0], sizes = [2, 8, 16], strides = [1, 1, 1]} : vector<2x16x16xf32> to vector<2x8x16xf32>
    %78 = arith.maximumf %76, %77 : vector<2x8x16xf32>
    %c2_44 = arith.constant 2 : index
    %79 = memref.load %arg7[%c2_44] : memref<3xf32, #tpu.memory_space<smem>>
    %cst_45 = arith.constant 0.000000e+00 : f32
    %80 = vector.broadcast %cst_45 : f32 to vector<2x8x16xf32>
    %81 = arith.cmpf oge, %78, %80 : vector<2x8x16xf32>
    %82 = vector.broadcast %79 : f32 to vector<2x8x16xf32>
    %83 = arith.mulf %82, %78 : vector<2x8x16xf32>
    %84 = arith.select %81, %78, %83 : vector<2x8x16xi1>, vector<2x8x16xf32>
    %85 = vector.shape_cast %84 : vector<2x8x16xf32> to vector<16x16xf32>
    %c0_46 = arith.constant 0 : index
    %c0_47 = arith.constant 0 : index
    %86 = vector.load %arg15[%c0_46, %c0_47] : memref<16x16xf32, #tpu.memory_space<vmem>>, vector<16x16xf32>
    tpu.vector_store %arg15[%c0_46, %c0_47], %85 {strides = array<i32>} : memref<16x16xf32, #tpu.memory_space<vmem>>, vector<16x16xf32>,
    %c0_48 = arith.constant 0 : index
    %c0_49 = arith.constant 0 : index
    %87 = vector.load %arg15[%c0_48, %c0_49] : memref<16x16xf32, #tpu.memory_space<vmem>>, vector<2x16xf32>
    %c0_50 = arith.constant 0 : index
    %c0_51 = arith.constant 0 : index
    %c0_52 = arith.constant 0 : index
    %88 = vector.load %arg8[%c0_50, %c0_51, %c0_52] : memref<8x16x128xf32, #tpu.memory_space<vmem>>, vector<1x16x128xf32>
    %89 = vector.shape_cast %88 : vector<1x16x128xf32> to vector<16x128xf32>
    %cst_53 = arith.constant dense<0.000000e+00> : vector<2x128xf32>
    %90 = tpu.matmul %87, %89, %cst_53 {dimension_numbers = #tpu.dot_dimension_numbers<[1], [0], [0], [1], [0, 0, 1, 1], [], []>} : vector<2x16xf32>, vector<16x128xf32>, vector<2x128xf32> -> vector<2x128xf32>
    %c2_54 = arith.constant 2 : index
    %c0_55 = arith.constant 0 : index
    %91 = vector.load %arg15[%c2_54, %c0_55] : memref<16x16xf32, #tpu.memory_space<vmem>>, vector<2x16xf32>
    %c1_56 = arith.constant 1 : index
    %c0_57 = arith.constant 0 : index
    %c0_58 = arith.constant 0 : index
    %92 = vector.load %arg8[%c1_56, %c0_57, %c0_58] : memref<8x16x128xf32, #tpu.memory_space<vmem>>, vector<1x16x128xf32>
    %93 = vector.shape_cast %92 : vector<1x16x128xf32> to vector<16x128xf32>
    %cst_59 = arith.constant dense<0.000000e+00> : vector<2x128xf32>
    %94 = tpu.matmul %91, %93, %cst_59 {dimension_numbers = #tpu.dot_dimension_numbers<[1], [0], [0], [1], [0, 0, 1, 1], [], []>} : vector<2x16xf32>, vector<16x128xf32>, vector<2x128xf32> -> vector<2x128xf32>
    %95 = arith.addf %90, %94 : vector<2x128xf32>
    %c4 = arith.constant 4 : index
    %c0_60 = arith.constant 0 : index
    %96 = vector.load %arg15[%c4, %c0_60] : memref<16x16xf32, #tpu.memory_space<vmem>>, vector<2x16xf32>
    %c2_61 = arith.constant 2 : index
    %c0_62 = arith.constant 0 : index
    %c0_63 = arith.constant 0 : index
    %97 = vector.load %arg8[%c2_61, %c0_62, %c0_63] : memref<8x16x128xf32, #tpu.memory_space<vmem>>, vector<1x16x128xf32>
    %98 = vector.shape_cast %97 : vector<1x16x128xf32> to vector<16x128xf32>
    %cst_64 = arith.constant dense<0.000000e+00> : vector<2x128xf32>
    %99 = tpu.matmul %96, %98, %cst_64 {dimension_numbers = #tpu.dot_dimension_numbers<[1], [0], [0], [1], [0, 0, 1, 1], [], []>} : vector<2x16xf32>, vector<16x128xf32>, vector<2x128xf32> -> vector<2x128xf32>
    %100 = arith.addf %95, %99 : vector<2x128xf32>
    %c6 = arith.constant 6 : index
    %c0_65 = arith.constant 0 : index
    %101 = vector.load %arg15[%c6, %c0_65] : memref<16x16xf32, #tpu.memory_space<vmem>>, vector<2x16xf32>
    %c3 = arith.constant 3 : index
    %c0_66 = arith.constant 0 : index
    %c0_67 = arith.constant 0 : index
    %102 = vector.load %arg8[%c3, %c0_66, %c0_67] : memref<8x16x128xf32, #tpu.memory_space<vmem>>, vector<1x16x128xf32>
    %103 = vector.shape_cast %102 : vector<1x16x128xf32> to vector<16x128xf32>
    %cst_68 = arith.constant dense<0.000000e+00> : vector<2x128xf32>
    %104 = tpu.matmul %101, %103, %cst_68 {dimension_numbers = #tpu.dot_dimension_numbers<[1], [0], [0], [1], [0, 0, 1, 1], [], []>} : vector<2x16xf32>, vector<16x128xf32>, vector<2x128xf32> -> vector<2x128xf32>
    %105 = arith.addf %100, %104 : vector<2x128xf32>
    %c8 = arith.constant 8 : index
    %c0_69 = arith.constant 0 : index
    %106 = vector.load %arg15[%c8, %c0_69] : memref<16x16xf32, #tpu.memory_space<vmem>>, vector<2x16xf32>
    %c4_70 = arith.constant 4 : index
    %c0_71 = arith.constant 0 : index
    %c0_72 = arith.constant 0 : index
    %107 = vector.load %arg8[%c4_70, %c0_71, %c0_72] : memref<8x16x128xf32, #tpu.memory_space<vmem>>, vector<1x16x128xf32>
    %108 = vector.shape_cast %107 : vector<1x16x128xf32> to vector<16x128xf32>
    %cst_73 = arith.constant dense<0.000000e+00> : vector<2x128xf32>
    %109 = tpu.matmul %106, %108, %cst_73 {dimension_numbers = #tpu.dot_dimension_numbers<[1], [0], [0], [1], [0, 0, 1, 1], [], []>} : vector<2x16xf32>, vector<16x128xf32>, vector<2x128xf32> -> vector<2x128xf32>
    %110 = arith.addf %105, %109 : vector<2x128xf32>
    %c10 = arith.constant 10 : index
    %c0_74 = arith.constant 0 : index
    %111 = vector.load %arg15[%c10, %c0_74] : memref<16x16xf32, #tpu.memory_space<vmem>>, vector<2x16xf32>
    %c5 = arith.constant 5 : index
    %c0_75 = arith.constant 0 : index
    %c0_76 = arith.constant 0 : index
    %112 = vector.load %arg8[%c5, %c0_75, %c0_76] : memref<8x16x128xf32, #tpu.memory_space<vmem>>, vector<1x16x128xf32>
    %113 = vector.shape_cast %112 : vector<1x16x128xf32> to vector<16x128xf32>
    %cst_77 = arith.constant dense<0.000000e+00> : vector<2x128xf32>
    %114 = tpu.matmul %111, %113, %cst_77 {dimension_numbers = #tpu.dot_dimension_numbers<[1], [0], [0], [1], [0, 0, 1, 1], [], []>} : vector<2x16xf32>, vector<16x128xf32>, vector<2x128xf32> -> vector<2x128xf32>
    %115 = arith.addf %110, %114 : vector<2x128xf32>
    %c12 = arith.constant 12 : index
    %c0_78 = arith.constant 0 : index
    %116 = vector.load %arg15[%c12, %c0_78] : memref<16x16xf32, #tpu.memory_space<vmem>>, vector<2x16xf32>
    %c6_79 = arith.constant 6 : index
    %c0_80 = arith.constant 0 : index
    %c0_81 = arith.constant 0 : index
    %117 = vector.load %arg8[%c6_79, %c0_80, %c0_81] : memref<8x16x128xf32, #tpu.memory_space<vmem>>, vector<1x16x128xf32>
    %118 = vector.shape_cast %117 : vector<1x16x128xf32> to vector<16x128xf32>
    %cst_82 = arith.constant dense<0.000000e+00> : vector<2x128xf32>
    %119 = tpu.matmul %116, %118, %cst_82 {dimension_numbers = #tpu.dot_dimension_numbers<[1], [0], [0], [1], [0, 0, 1, 1], [], []>} : vector<2x16xf32>, vector<16x128xf32>, vector<2x128xf32> -> vector<2x128xf32>
    %120 = arith.addf %115, %119 : vector<2x128xf32>
    %c14 = arith.constant 14 : index
    %c0_83 = arith.constant 0 : index
    %121 = vector.load %arg15[%c14, %c0_83] : memref<16x16xf32, #tpu.memory_space<vmem>>, vector<2x16xf32>
    %c7 = arith.constant 7 : index
    %c0_84 = arith.constant 0 : index
    %c0_85 = arith.constant 0 : index
    %122 = vector.load %arg8[%c7, %c0_84, %c0_85] : memref<8x16x128xf32, #tpu.memory_space<vmem>>, vector<1x16x128xf32>
    %123 = vector.shape_cast %122 : vector<1x16x128xf32> to vector<16x128xf32>
    %cst_86 = arith.constant dense<0.000000e+00> : vector<2x128xf32>
    %124 = tpu.matmul %121, %123, %cst_86 {dimension_numbers = #tpu.dot_dimension_numbers<[1], [0], [0], [1], [0, 0, 1, 1], [], []>} : vector<2x16xf32>, vector<16x128xf32>, vector<2x128xf32> -> vector<2x128xf32>
    %125 = arith.addf %120, %124 : vector<2x128xf32>
    %c0_87 = arith.constant 0 : index
    %c0_88 = arith.constant 0 : index
    %126 = vector.load %arg9[%c0_87, %c0_88] : memref<1x128xf32, #tpu.memory_space<vmem>>, vector<1x128xf32>
    %127 = vector.broadcast %126 : vector<1x128xf32> to vector<2x128xf32>
    %128 = arith.addf %125, %127 : vector<2x128xf32>
    %cst_89 = arith.constant 0.000000e+00 : f32
    %129 = vector.broadcast %cst_89 : f32 to vector<2x128xf32>
    %130 = arith.maximumf %128, %129 : vector<2x128xf32>
    %c0_90 = arith.constant 0 : index
    %c0_91 = arith.constant 0 : index
    %131 = vector.load %arg10[%c0_90, %c0_91] : memref<128x128xf32, #tpu.memory_space<vmem>>, vector<128x128xf32>
    %cst_92 = arith.constant dense<0.000000e+00> : vector<2x128xf32>
    %132 = tpu.matmul %130, %131, %cst_92 {dimension_numbers = #tpu.dot_dimension_numbers<[1], [0], [0], [1], [0, 0, 1, 1], [], []>} : vector<2x128xf32>, vector<128x128xf32>, vector<2x128xf32> -> vector<2x128xf32>
    %c0_93 = arith.constant 0 : index
    %c0_94 = arith.constant 0 : index
    %133 = vector.load %arg11[%c0_93, %c0_94] : memref<1x128xf32, #tpu.memory_space<vmem>>, vector<1x128xf32>
    %134 = vector.broadcast %133 : vector<1x128xf32> to vector<2x128xf32>
    %135 = arith.addf %132, %134 : vector<2x128xf32>
    %cst_95 = arith.constant 0.000000e+00 : f32
    %136 = vector.broadcast %cst_95 : f32 to vector<2x128xf32>
    %137 = arith.maximumf %135, %136 : vector<2x128xf32>
    %c0_96 = arith.constant 0 : index
    %c0_97 = arith.constant 0 : index
    %138 = vector.load %arg12[%c0_96, %c0_97] : memref<128x1xf32, #tpu.memory_space<vmem>>, vector<128x1xf32>
    %cst_98 = arith.constant dense<0.000000e+00> : vector<2x1xf32>
    %139 = tpu.matmul %137, %138, %cst_98 {dimension_numbers = #tpu.dot_dimension_numbers<[1], [0], [0], [1], [0, 0, 1, 1], [], []>} : vector<2x128xf32>, vector<128x1xf32>, vector<2x1xf32> -> vector<2x1xf32>
    %c0_99 = arith.constant 0 : index
    %c0_100 = arith.constant 0 : index
    %140 = vector.load %arg13[%c0_99, %c0_100] : memref<1x1xf32, #tpu.memory_space<vmem>>, vector<1x1xf32>
    %141 = vector.broadcast %140 : vector<1x1xf32> to vector<2x1xf32>
    %142 = arith.addf %139, %141 : vector<2x1xf32>
    %c0_101 = arith.constant 0 : index
    %c0_102 = arith.constant 0 : index
    %143 = vector.load %arg14[%c0_101, %c0_102] : memref<2x1xf32, #tpu.memory_space<vmem>>, vector<2x1xf32>
    tpu.vector_store %arg14[%c0_101, %c0_102], %142 {strides = array<i32>} : memref<2x1xf32, #tpu.memory_space<vmem>>, vector<2x1xf32>,
    return
  }
}

</mosaic_0001>

<bundles_post_ra>
// kernel: tpu_custom_call.1
= control target key start
LH: loop header
LB: loop body
LE: loop exit
PB: predicated region body
PF: predicated region fallthrough
CT: control target
= control target key end

     0   :  { %s4534_s0 = inlined_call_operand.vmem [shape: f32[256,1], index: 0, kind: input, shape index: {}]   ;;  %s4535_s1 = inlined_call_operand.vmem [shape: f32[3,1,4], index: 1, kind: input, shape index: {}]   ;;  %s4536_s2 = inlined_call_operand.vmem [shape: f32[1,4], index: 2, kind: input, shape index: {}]   ;;  %s4537_s3 = inlined_call_operand.vmem [shape: f32[3,4,8], index: 3, kind: input, shape index: {}]   ;;  %s4538_s4 = inlined_call_operand.vmem [shape: f32[1,8], index: 4, kind: input, shape index: {}]   ;;  %s4539_s5 = inlined_call_operand.vmem [shape: f32[3,8,16], index: 5, kind: input, shape index: {}]   ;;  %s4540_s6 = inlined_call_operand.vmem [shape: f32[1,16], index: 6, kind: input, shape index: {}]   ;;  %s4541_s7 = inlined_call_operand.vmem [shape: f32[3], index: 7, kind: input, shape index: {}]   ;;  %s4542_s8 = inlined_call_operand.vmem [shape: f32[8,16,128], index: 8, kind: input, shape index: {}]   ;;  %s4543_s9 = inlined_call_operand.vmem [shape: f32[1,128], index: 9, kind: input, shape index: {}]   ;;  %s4544_s10 = inlined_call_operand.vmem [shape: f32[128,128], index: 10, kind: input, shape index: {}]   ;;  %s4545_s11 = inlined_call_operand.vmem [shape: f32[1,128], index: 11, kind: input, shape index: {}]   ;;  %s4546_s12 = inlined_call_operand.vmem [shape: f32[128,1], index: 12, kind: input, shape index: {}]   ;;  %s4547_s13 = inlined_call_operand.<no memory space> [shape: f32[1,1], index: 13, kind: input, shape index: {}]   ;;  %s4548_s14 = inlined_call_operand.vmem [shape: f32[2,1], index: 14, kind: output, shape index: {}]  }
   0x1   :  { %v19_v0 = vstv %s4547_s13 }
   0x2   :  { %20 = vst [vmem:[#allocation3] sm:$0x1] %v19_v0 }
   0x3   :  { %21 = vsyncpa [#allocation5], 0  ;;  %s42_s17 = sshll.u32 %s4541_s7, 4  ;;  %s43_s17 = int_to_ptr.vmem [resolvable:$true] %s42_s17 }
   0x4   :  { %s3565_s18 = scalar_lea.vmem %s43_s17, 16  ;;  %p3570_p1 = scmp.lt.s32.totalorder %s43_s17, %s43_s17 }
   0x5   :  { %p3566_p0 = scmp.ne.s32.totalorder %s43_s17, %s3565_s18  ;;  %p3571_p2 = scmp.lt.s32.totalorder %s3565_s18, %s3565_s18 }
   0x7   :  { %p3572_p3 = por %p3571_p2, %p3570_p1 }
   0x9   :  { %p3573_p4 = pnand %p3572_p3, %p3566_p0 }
   0xb   :  { %3576 = shalt.err (!%p3573_p4)
}
   0xc   :  { %s3579_s19 = smov [#allocation4]  }
   0xd   :  { %45 = dma.vmem_to_smem %s43_s17, 16, %s3579_s19, [#allocation5]  }
   0xe   :  { %3577 = dma.done.wait [#allocation5], 16  }
   0xf   :  { %3578 = vsyncadd [#allocation5], 4294967280 }
  0x10   :  { %61 = sfence }
  0x11   :  { %v2616_v1 = vld [vmem:[%s4535_s1 + $0x1] sm:$0x1]  ;;  %vm189_vm0 = vcmask 1040384   ;;  %v3670_v2 = vld [vmem:[%s4534_s0 + $0x8] sm:$0xff]  ;;  %vm98_vm1 = vcmask 7168   ;;  %v3675_v3 = vld [vmem:[%s4534_s0 + $0x10] sm:$0xff] }
  0x12   :  { %3007 = vmatprep.subr.msk.mxu0 %vm189_vm0, %v2616_v1  ;;  %3009 = vmatprep.mubr.msk.f32.mxu0 %vm98_vm1, %v3670_v2  ;;  %v95_v4 = vld [vmem:[%s4535_s1] sm:$0x1]  ;;  %v3686_v5 = vld [vmem:[%s4534_s0 + $0x18] sm:$0xff]  ;;  %v3703_v7 = vld [vmem:[%s4534_s0 + $0x28] sm:$0xff]  ;;  %v3580_v36 = vmov 0.0   ;;  %vm1024_vm2 = vcmask 1043456  }
  0x13   :  { %3008 = vmatpush3.msk.msra.mxu0 %vm189_vm0, %v2616_v1  ;;  %v3698_v6 = vld [vmem:[%s4534_s0 + $0x20] sm:$0xff]  ;;  %v3712_v8 = vld [vmem:[%s4534_s0 + $0x30] sm:$0xff]  ;;  %v3717_v9 = vld [vmem:[%s4534_s0 + $0x38] sm:$0xff]  ;;  %3148 = vmatprep.subr.mxu1 %v3580_v36  ;;  %vm3581_vm3 = vmmov 0   ;;  %s933_s18 = sld [smem:[#allocation4]]  ;;  %vm984_vm5 = vcmask 31744  }
  0x14   :  { %3010 = vmatmul.mubr.msk.f32.vlgmr.msra.gmra.mrb[0].mxu0 %vm98_vm1, %v3675_v3  ;;  %3054 = vmatprep.subr.msk.mxu0 %vm189_vm0, %v95_v4  ;;  %v2679_v10 = vld [vmem:[%s4535_s1 + $0x2] sm:$0x1]  ;;  %v3735_v12 = vld [vmem:[%s4534_s0 + $0x48] sm:$0xff]  ;;  %v3744_v13 = vld [vmem:[%s4534_s0 + $0x50] sm:$0xff]  ;;  %s2757_s28 = sld [smem:[#allocation4 + $0x1]] }
  0x15   :  { %3055 = vmatpush3.msk.msra.mxu0 %vm189_vm0, %v95_v4  ;;  %3012 = vmatprep.mubr.msk.f32.mxu0 %vm98_vm1, %v3686_v5  ;;  %v3729_v11 = vld [vmem:[%s4534_s0 + $0x40] sm:$0xff]  ;;  %v3749_v14 = vld [vmem:[%s4534_s0 + $0x58] sm:$0xff]  ;;  %v3763_v16 = vld [vmem:[%s4534_s0 + $0x68] sm:$0xff] }
  0x16   :  { %3101 = vmatprep.subr.msk.mxu0 %vm189_vm0, %v2679_v10  ;;  %v3758_v15 = vld [vmem:[%s4534_s0 + $0x60] sm:$0xff]  ;;  %v3772_v17 = vld [vmem:[%s4534_s0 + $0x70] sm:$0xff]  ;;  %v3777_v18 = vld [vmem:[%s4534_s0 + $0x78] sm:$0xff]  ;;  %3150 = vmatprep.mubr.msk.f32.mxu1 %vm3581_vm3, %v3580_v36 }
  0x17   :  { %v3786_v19 = vld [vmem:[%s4534_s0 + $0x80] sm:$0xff]  ;;  %v3791_v20 = vld [vmem:[%s4534_s0 + $0x88] sm:$0xff]  ;;  %v3800_v21 = vld [vmem:[%s4534_s0 + $0x90] sm:$0xff] }
  0x18   :  { %3013 = vmatmul.mubr.msk.f32.gmra.mrb[2].mxu0 %vm98_vm1, %v3698_v6  ;;  %v3805_v22 = vld [vmem:[%s4534_s0 + $0x98] sm:$0xff]  ;;  %v3814_v23 = vld [vmem:[%s4534_s0 + $0xa0] sm:$0xff]  ;;  %v3819_v24 = vld [vmem:[%s4534_s0 + $0xa8] sm:$0xff] }
  0x19   :  { %3015 = vmatprep.mubr.msk.f32.mxu0 %vm98_vm1, %v3703_v7  ;;  %v3828_v25 = vld [vmem:[%s4534_s0 + $0xb0] sm:$0xff]  ;;  %v3833_v26 = vld [vmem:[%s4534_s0 + $0xb8] sm:$0xff]  ;;  %v3842_v27 = vld [vmem:[%s4534_s0 + $0xc0] sm:$0xff]  ;;  %v4030_v50 = vstv %s933_s18 }
  0x1a   :  { %v3847_v28 = vld [vmem:[%s4534_s0 + $0xc8] sm:$0xff]  ;;  %v3856_v29 = vld [vmem:[%s4534_s0 + $0xd0] sm:$0xff]  ;;  %v3861_v30 = vld [vmem:[%s4534_s0 + $0xd8] sm:$0xff] }
  0x1b   :  { %v3870_v31 = vld [vmem:[%s4534_s0 + $0xe0] sm:$0xff]  ;;  %v3875_v32 = vld [vmem:[%s4534_s0 + $0xe8] sm:$0xff]  ;;  %v92_v33 = vld [vmem:[%s4534_s0 + $0xf0] sm:$0xff] }
  0x1c   :  { %3016 = vmatmul.mubr.msk.f32.gmra.mrb[4].mxu0 %vm98_vm1, %v3712_v8  ;;  %v62_v34 = vld [vmem:[%s4534_s0] sm:$0xff]  ;;  %v93_v35 = vld [vmem:[%s4534_s0 + $0xf8] sm:$0xff]  ;;  %s2773_s0 = sld [smem:[#allocation4 + $0x2]] }
  0x1d   :  { %3018 = vmatprep.mubr.msk.f32.mxu0 %vm98_vm1, %v3717_v9  ;;  %v2712_v37 = vld [vmem:[%s4537_s3 + $0x4] sm:$0xf]  ;;  %v4022_v38 = vld [vmem:[%s4536_s2] ss:$0 sm:$0xff] }
  0x1e   :  { %3149 = vmatpush3.msk.msra.mxu1 %vm1024_vm2, %v2712_v37  ;;  %v981_v55 = vld [vmem:[%s4537_s3] sm:$0xf] }
  0x1f   :  { %3189 = vmatprep.subr.mxu1 %v3580_v36 }
  0x20   :  { %3019 = vmatmul.mubr.msk.f32.gmra.mrb[6].mxu0 %vm98_vm1, %v3729_v11 }
  0x21   :  { %3021 = vmatprep.mubr.msk.f32.mxu0 %vm98_vm1, %v3735_v12 }
  0x24   :  { %3022 = vmatmul.mubr.msk.f32.gmra.mrb[8].mxu0 %vm98_vm1, %v3744_v13 }
  0x25   :  { %3024 = vmatprep.mubr.msk.f32.mxu0 %vm98_vm1, %v3749_v14 }
  0x28   :  { %3025 = vmatmul.mubr.msk.f32.gmra.mrb[10].mxu0 %vm98_vm1, %v3758_v15 }
  0x29   :  { %3027 = vmatprep.mubr.msk.f32.mxu0 %vm98_vm1, %v3763_v16 }
  0x2c   :  { %3028 = vmatmul.mubr.msk.f32.gmra.mrb[12].mxu0 %vm98_vm1, %v3772_v17 }
  0x2d   :  { %3030 = vmatprep.mubr.msk.f32.mxu0 %vm98_vm1, %v3777_v18 }
  0x30   :  { %3031 = vmatmul.mubr.msk.f32.gmra.mrb[14].mxu0 %vm98_vm1, %v3786_v19 }
  0x31   :  { %3033 = vmatprep.mubr.msk.f32.mxu0 %vm98_vm1, %v3791_v20 }
  0x34   :  { %3034 = vmatmul.mubr.msk.f32.gmra.mrb[16].mxu0 %vm98_vm1, %v3800_v21 }
  0x35   :  { %3036 = vmatprep.mubr.msk.f32.mxu0 %vm98_vm1, %v3805_v22 }
  0x38   :  { %3037 = vmatmul.mubr.msk.f32.gmra.mrb[18].mxu0 %vm98_vm1, %v3814_v23 }
  0x39   :  { %3039 = vmatprep.mubr.msk.f32.mxu0 %vm98_vm1, %v3819_v24 }
  0x3c   :  { %3040 = vmatmul.mubr.msk.f32.gmra.mrb[20].mxu0 %vm98_vm1, %v3828_v25 }
  0x3d   :  { %3042 = vmatprep.mubr.msk.f32.mxu0 %vm98_vm1, %v3833_v26 }
  0x40   :  { %3043 = vmatmul.mubr.msk.f32.gmra.mrb[22].mxu0 %vm98_vm1, %v3842_v27 }
  0x41   :  { %3045 = vmatprep.mubr.msk.f32.mxu0 %vm98_vm1, %v3847_v28 }
  0x44   :  { %3046 = vmatmul.mubr.msk.f32.gmra.mrb[24].mxu0 %vm98_vm1, %v3856_v29 }
  0x45   :  { %3048 = vmatprep.mubr.msk.f32.mxu0 %vm98_vm1, %v3861_v30 }
  0x48   :  { %3049 = vmatmul.mubr.msk.f32.gmra.mrb[26].mxu0 %vm98_vm1, %v3870_v31 }
  0x49   :  { %3051 = vmatprep.mubr.msk.f32.mxu0 %vm98_vm1, %v3875_v32 }
  0x4c   :  { %3052 = vmatmul.mubr.msk.f32.gmra.mrb[28].mxu0 %vm98_vm1, %v92_v33 }
  0x4d   :  { %3056 = vmatprep.mubr.msk.f32.mxu0 %vm98_vm1, %v62_v34 }
  0x50   :  { %3057 = vmatmul.mubr.msk.f32.vlgmr.msra.gmra.mrb[0].mxu0 %vm98_vm1, %v3670_v2 }
  0x51   :  { %3102 = vmatpush3.msk.msra.mxu0 %vm189_vm0, %v2679_v10  ;;  %3059 = vmatprep.mubr.msk.f32.mxu0 %vm98_vm1, %v3675_v3 }
  0x54   :  { %3060 = vmatmul.mubr.msk.f32.gmra.mrb[2].mxu0 %vm98_vm1, %v3686_v5 }
  0x55   :  { %3062 = vmatprep.mubr.msk.f32.mxu0 %vm98_vm1, %v3698_v6 }
  0x58   :  { %3063 = vmatmul.mubr.msk.f32.gmra.mrb[4].mxu0 %vm98_vm1, %v3703_v7 }
  0x59   :  { %3065 = vmatprep.mubr.msk.f32.mxu0 %vm98_vm1, %v3712_v8 }
  0x5c   :  { %3066 = vmatmul.mubr.msk.f32.gmra.mrb[6].mxu0 %vm98_vm1, %v3717_v9 }
  0x5d   :  { %3068 = vmatprep.mubr.msk.f32.mxu0 %vm98_vm1, %v3729_v11 }
  0x60   :  { %3069 = vmatmul.mubr.msk.f32.gmra.mrb[8].mxu0 %vm98_vm1, %v3735_v12 }
  0x61   :  { %3071 = vmatprep.mubr.msk.f32.mxu0 %vm98_vm1, %v3744_v13 }
  0x64   :  { %3072 = vmatmul.mubr.msk.f32.gmra.mrb[10].mxu0 %vm98_vm1, %v3749_v14 }
  0x65   :  { %3074 = vmatprep.mubr.msk.f32.mxu0 %vm98_vm1, %v3758_v15 }
  0x68   :  { %3075 = vmatmul.mubr.msk.f32.gmra.mrb[12].mxu0 %vm98_vm1, %v3763_v16 }
  0x69   :  { %3077 = vmatprep.mubr.msk.f32.mxu0 %vm98_vm1, %v3772_v17 }
  0x6c   :  { %3078 = vmatmul.mubr.msk.f32.gmra.mrb[14].mxu0 %vm98_vm1, %v3777_v18 }
  0x6d   :  { %3080 = vmatprep.mubr.msk.f32.mxu0 %vm98_vm1, %v3786_v19 }
  0x70   :  { %3081 = vmatmul.mubr.msk.f32.gmra.mrb[16].mxu0 %vm98_vm1, %v3791_v20 }
  0x71   :  { %3083 = vmatprep.mubr.msk.f32.mxu0 %vm98_vm1, %v3800_v21 }
  0x74   :  { %3084 = vmatmul.mubr.msk.f32.gmra.mrb[18].mxu0 %vm98_vm1, %v3805_v22 }
  0x75   :  { %3086 = vmatprep.mubr.msk.f32.mxu0 %vm98_vm1, %v3814_v23 }
  0x78   :  { %3087 = vmatmul.mubr.msk.f32.gmra.mrb[20].mxu0 %vm98_vm1, %v3819_v24 }
  0x79   :  { %3089 = vmatprep.mubr.msk.f32.mxu0 %vm98_vm1, %v3828_v25 }
  0x7c   :  { %3090 = vmatmul.mubr.msk.f32.gmra.mrb[22].mxu0 %vm98_vm1, %v3833_v26 }
  0x7d   :  { %3092 = vmatprep.mubr.msk.f32.mxu0 %vm98_vm1, %v3842_v27 }
  0x80   :  { %3093 = vmatmul.mubr.msk.f32.gmra.mrb[24].mxu0 %vm98_vm1, %v3847_v28 }
  0x81   :  { %3095 = vmatprep.mubr.msk.f32.mxu0 %vm98_vm1, %v3856_v29 }
  0x84   :  { %3096 = vmatmul.mubr.msk.f32.gmra.mrb[26].mxu0 %vm98_vm1, %v3861_v30 }
  0x85   :  { %3098 = vmatprep.mubr.msk.f32.mxu0 %vm98_vm1, %v3870_v31 }
  0x88   :  { %3099 = vmatmul.mubr.msk.f32.gmra.mrb[28].mxu0 %vm98_vm1, %v3875_v32 }
  0x89   :  { %3103 = vmatprep.mubr.msk.f32.mxu0 %vm98_vm1, %v3675_v3 }
  0x8c   :  { %3104 = vmatmul.mubr.msk.f32.vlgmr.msra.gmra.mrb[0].mxu0 %vm98_vm1, %v3686_v5 }
  0x8d   :  { %3106 = vmatprep.mubr.msk.f32.mxu0 %vm98_vm1, %v3698_v6 }
  0x90   :  { %3107 = vmatmul.mubr.msk.f32.gmra.mrb[2].mxu0 %vm98_vm1, %v3703_v7 }
  0x91   :  { %3109 = vmatprep.mubr.msk.f32.mxu0 %vm98_vm1, %v3712_v8 }
  0x94   :  { %3110 = vmatmul.mubr.msk.f32.gmra.mrb[4].mxu0 %vm98_vm1, %v3717_v9 }
  0x95   :  { %3112 = vmatprep.mubr.msk.f32.mxu0 %vm98_vm1, %v3729_v11 }
  0x98   :  { %3113 = vmatmul.mubr.msk.f32.gmra.mrb[6].mxu0 %vm98_vm1, %v3735_v12 }
  0x99   :  { %3115 = vmatprep.mubr.msk.f32.mxu0 %vm98_vm1, %v3744_v13 }
  0x9c   :  { %3116 = vmatmul.mubr.msk.f32.gmra.mrb[8].mxu0 %vm98_vm1, %v3749_v14 }
  0x9d   :  { %3118 = vmatprep.mubr.msk.f32.mxu0 %vm98_vm1, %v3758_v15 }
  0xa0   :  { %3119 = vmatmul.mubr.msk.f32.gmra.mrb[10].mxu0 %vm98_vm1, %v3763_v16 }
  0xa1   :  { %3121 = vmatprep.mubr.msk.f32.mxu0 %vm98_vm1, %v3772_v17 }
  0xa4   :  { %3122 = vmatmul.mubr.msk.f32.gmra.mrb[12].mxu0 %vm98_vm1, %v3777_v18 }
  0xa5   :  { %3124 = vmatprep.mubr.msk.f32.mxu0 %vm98_vm1, %v3786_v19 }
  0xa8   :  { %3125 = vmatmul.mubr.msk.f32.gmra.mrb[14].mxu0 %vm98_vm1, %v3791_v20 }
  0xa9   :  { %3127 = vmatprep.mubr.msk.f32.mxu0 %vm98_vm1, %v3800_v21 }
  0xac   :  { %3128 = vmatmul.mubr.msk.f32.gmra.mrb[16].mxu0 %vm98_vm1, %v3805_v22 }
  0xad   :  { %3130 = vmatprep.mubr.msk.f32.mxu0 %vm98_vm1, %v3814_v23 }
  0xb0   :  { %3131 = vmatmul.mubr.msk.f32.gmra.mrb[18].mxu0 %vm98_vm1, %v3819_v24 }
  0xb1   :  { %3133 = vmatprep.mubr.msk.f32.mxu0 %vm98_vm1, %v3828_v25 }
  0xb4   :  { %3134 = vmatmul.mubr.msk.f32.gmra.mrb[20].mxu0 %vm98_vm1, %v3833_v26 }
  0xb5   :  { %3136 = vmatprep.mubr.msk.f32.mxu0 %vm98_vm1, %v3842_v27 }
  0xb8   :  { %3137 = vmatmul.mubr.msk.f32.gmra.mrb[22].mxu0 %vm98_vm1, %v3847_v28 }
  0xb9   :  { %3139 = vmatprep.mubr.msk.f32.mxu0 %vm98_vm1, %v3856_v29 }
  0xbc   :  { %3140 = vmatmul.mubr.msk.f32.gmra.mrb[24].mxu0 %vm98_vm1, %v3861_v30 }
  0xbd   :  { %3142 = vmatprep.mubr.msk.f32.mxu0 %vm98_vm1, %v3870_v31 }
  0xc0   :  { %3143 = vmatmul.mubr.msk.f32.gmra.mrb[26].mxu0 %vm98_vm1, %v3875_v32 }
  0xc1   :  { %3145 = vmatprep.mubr.msk.f32.mxu0 %vm98_vm1, %v92_v33 }
  0xc4   :  { %3146 = vmatmul.mubr.msk.f32.gmra.mrb[28].mxu0 %vm98_vm1, %v93_v35 }
  0xc5   :  { %3299 = vmatprep.mubr.msk.f32.mxu0 %vm3581_vm3, %v3580_v36 }
 0x15f   :  { %v3105_v39 = vpop.f32.mrb[0].mxu0 }
 0x160   :  { %v889_v40 = vadd.f32 %v3105_v39, %v4022_v38  ;;  %v703_v41 = vpop.f32.mrb[1].mxu0 }
 0x161   :  { %v888_v42 = vadd.f32 %v4022_v38, %v703_v41 }
 0x163   :  { %v4026_v43 = vmax.f32 %v888_v42, %v889_v40  ;;  %v3108_v44 = vpop.f32.mrb[2].mxu0 }
 0x164   :  { %v891_v45 = vadd.f32 %v3108_v44, %v4022_v38  ;;  %v713_v46 = vpop.f32.mrb[3].mxu0 }
 0x165   :  { %v890_v47 = vadd.f32 %v4022_v38, %v713_v46 }
 0x167   :  { %v919_v48 = vmax.f32 %v890_v47, %v891_v45  ;;  %v3111_v49 = vpop.f32.mrb[4].mxu0 }
 0x168   :  { %v893_v51 = vadd.f32 %v3111_v49, %v4022_v38  ;;  %v723_v52 = vpop.f32.mrb[5].mxu0 }
 0x169   :  { %v951_v53 = vmul.f32 %v4030_v50, %v919_v48  ;;  %v892_v54 = vadd.f32 %v4022_v38, %v723_v52  ;;  %vm935_vm4 = vcmp.ge.f32.partialorder %v919_v48, 0.0 }
 0x16b   :  { %v920_v56 = vmax.f32 %v892_v54, %v893_v51  ;;  %v3114_v57 = vpop.f32.mrb[6].mxu0  ;;  %v4038_v58 = vsel %vm935_vm4, %v919_v48, %v951_v53  ;;  %vm934_vm4 = vcmp.ge.f32.partialorder %v4026_v43, 0.0 }
 0x16c   :  { %v895_v59 = vadd.f32 %v3114_v57, %v4022_v38  ;;  %v733_v60 = vpop.f32.mrb[7].mxu0  ;;  %3151 = vmatmul.mubr.msk.f32.vlgmr.msra.gmra.mrb[0].mxu1 %vm984_vm5, %v4038_v58 }
 0x16d   :  { %v952_v61 = vmul.f32 %v4030_v50, %v920_v56  ;;  %v894_v62 = vadd.f32 %v4022_v38, %v733_v60  ;;  %3190 = vmatpush3.msk.msra.mxu1 %vm1024_vm2, %v981_v55  ;;  %3153 = vmatprep.mubr.msk.f32.mxu1 %vm3581_vm3, %v3580_v36  ;;  %vm936_vm6 = vcmp.ge.f32.partialorder %v920_v56, 0.0 }
 0x16e   :  { %3230 = vmatprep.subr.mxu1 %v3580_v36 }
 0x16f   :  { %v921_v63 = vmax.f32 %v894_v62, %v895_v59  ;;  %v3117_v0 = vpop.f32.mrb[8].mxu0  ;;  %v4049_v1 = vsel %vm936_vm6, %v920_v56, %v952_v61 }
 0x170   :  { %v897_v2 = vadd.f32 %v3117_v0, %v4022_v38  ;;  %v743_v3 = vpop.f32.mrb[9].mxu0  ;;  %3154 = vmatmul.mubr.msk.f32.gmra.mrb[2].mxu1 %vm984_vm5, %v4049_v1 }
 0x171   :  { %v953_v4 = vmul.f32 %v4030_v50, %v921_v63  ;;  %v896_v5 = vadd.f32 %v4022_v38, %v743_v3  ;;  %3156 = vmatprep.mubr.msk.f32.mxu1 %vm3581_vm3, %v3580_v36  ;;  %vm937_vm7 = vcmp.ge.f32.partialorder %v921_v63, 0.0 }
 0x173   :  { %v922_v6 = vmax.f32 %v896_v5, %v897_v2  ;;  %v3120_v7 = vpop.f32.mrb[10].mxu0  ;;  %v4058_v8 = vsel %vm937_vm7, %v921_v63, %v953_v4 }
 0x174   :  { %v899_v9 = vadd.f32 %v3120_v7, %v4022_v38  ;;  %v753_v10 = vpop.f32.mrb[11].mxu0  ;;  %3157 = vmatmul.mubr.msk.f32.gmra.mrb[4].mxu1 %vm984_vm5, %v4058_v8 }
 0x175   :  { %v954_v11 = vmul.f32 %v4030_v50, %v922_v6  ;;  %v898_v12 = vadd.f32 %v4022_v38, %v753_v10  ;;  %3159 = vmatprep.mubr.msk.f32.mxu1 %vm3581_vm3, %v3580_v36  ;;  %vm938_vm8 = vcmp.ge.f32.partialorder %v922_v6, 0.0 }
 0x177   :  { %v923_v13 = vmax.f32 %v898_v12, %v899_v9  ;;  %v3123_v14 = vpop.f32.mrb[12].mxu0  ;;  %v4067_v15 = vsel %vm938_vm8, %v922_v6, %v954_v11 }
 0x178   :  { %v901_v16 = vadd.f32 %v3123_v14, %v4022_v38  ;;  %v763_v17 = vpop.f32.mrb[13].mxu0  ;;  %3160 = vmatmul.mubr.msk.f32.gmra.mrb[6].mxu1 %vm984_vm5, %v4067_v15 }
 0x179   :  { %v955_v18 = vmul.f32 %v4030_v50, %v923_v13  ;;  %v900_v19 = vadd.f32 %v4022_v38, %v763_v17  ;;  %3162 = vmatprep.mubr.msk.f32.mxu1 %vm3581_vm3, %v3580_v36  ;;  %vm939_vm9 = vcmp.ge.f32.partialorder %v923_v13, 0.0 }
 0x17b   :  { %v924_v20 = vmax.f32 %v900_v19, %v901_v16  ;;  %v3126_v21 = vpop.f32.mrb[14].mxu0  ;;  %v4076_v22 = vsel %vm939_vm9, %v923_v13, %v955_v18 }
 0x17c   :  { %v903_v23 = vadd.f32 %v3126_v21, %v4022_v38  ;;  %v773_v24 = vpop.f32.mrb[15].mxu0  ;;  %3163 = vmatmul.mubr.msk.f32.gmra.mrb[8].mxu1 %vm984_vm5, %v4076_v22 }
 0x17d   :  { %v956_v25 = vmul.f32 %v4030_v50, %v924_v20  ;;  %v902_v26 = vadd.f32 %v4022_v38, %v773_v24  ;;  %3165 = vmatprep.mubr.msk.f32.mxu1 %vm3581_vm3, %v3580_v36  ;;  %vm940_vm10 = vcmp.ge.f32.partialorder %v924_v20, 0.0 }
 0x17f   :  { %v925_v27 = vmax.f32 %v902_v26, %v903_v23  ;;  %v3129_v28 = vpop.f32.mrb[16].mxu0  ;;  %v4085_v29 = vsel %vm940_vm10, %v924_v20, %v956_v25  ;;  %v950_v20 = vmul.f32 %v4030_v50, %v4026_v43 }
 0x180   :  { %v905_v30 = vadd.f32 %v3129_v28, %v4022_v38  ;;  %v783_v31 = vpop.f32.mrb[17].mxu0  ;;  %3166 = vmatmul.mubr.msk.f32.gmra.mrb[10].mxu1 %vm984_vm5, %v4085_v29 }
 0x181   :  { %v957_v32 = vmul.f32 %v4030_v50, %v925_v27  ;;  %v904_v33 = vadd.f32 %v4022_v38, %v783_v31  ;;  %3168 = vmatprep.mubr.msk.f32.mxu1 %vm3581_vm3, %v3580_v36  ;;  %vm941_vm11 = vcmp.ge.f32.partialorder %v925_v27, 0.0  ;;  %v965_v25 = vsel %vm934_vm4, %v4026_v43, %v950_v20  ;;  %v2758_v43 = vld [vmem:[%s4539_s5 + $0x8] sm:$0xff]  ;;  %v4265_v31 = vld [vmem:[%s4539_s5] sm:$0xff] }
 0x183   :  { %v926_v34 = vmax.f32 %v904_v33, %v905_v30  ;;  %v3132_v35 = vpop.f32.mrb[18].mxu0  ;;  %v4094_v37 = vsel %vm941_vm11, %v925_v27, %v957_v32 }
 0x184   :  { %v907_v39 = vadd.f32 %v3132_v35, %v4022_v38  ;;  %v793_v40 = vpop.f32.mrb[19].mxu0  ;;  %3169 = vmatmul.mubr.msk.f32.gmra.mrb[12].mxu1 %vm984_vm5, %v4094_v37 }
 0x185   :  { %v958_v41 = vmul.f32 %v4030_v50, %v926_v34  ;;  %v906_v42 = vadd.f32 %v4022_v38, %v793_v40  ;;  %3171 = vmatprep.mubr.msk.f32.mxu1 %vm3581_vm3, %v3580_v36  ;;  %vm942_vm12 = vcmp.ge.f32.partialorder %v926_v34, 0.0 }
 0x187   :  { %v927_v44 = vmax.f32 %v906_v42, %v907_v39  ;;  %v3135_v45 = vpop.f32.mrb[20].mxu0  ;;  %v4103_v46 = vsel %vm942_vm12, %v926_v34, %v958_v41 }
 0x188   :  { %v909_v47 = vadd.f32 %v3135_v45, %v4022_v38  ;;  %v803_v48 = vpop.f32.mrb[21].mxu0  ;;  %3172 = vmatmul.mubr.msk.f32.gmra.mrb[14].mxu1 %vm984_vm5, %v4103_v46  ;;  %v2774_v45 = vld [vmem:[%s4542_s8 + $0x10] sm:$0xff] }
 0x189   :  { %v959_v49 = vmul.f32 %v4030_v50, %v927_v44  ;;  %v908_v51 = vadd.f32 %v4022_v38, %v803_v48  ;;  %3174 = vmatprep.mubr.msk.f32.mxu1 %vm3581_vm3, %v3580_v36  ;;  %vm943_vm13 = vcmp.ge.f32.partialorder %v927_v44, 0.0 }
 0x18b   :  { %v928_v52 = vmax.f32 %v908_v51, %v909_v47  ;;  %v3138_v53 = vpop.f32.mrb[22].mxu0  ;;  %v4112_v54 = vsel %vm943_vm13, %v927_v44, %v959_v49  ;;  %v3582_v47 = vmov 0.0|0.0   ;;  %vm1789_vm13 = vcmask 130048  }
 0x18c   :  { %v911_v55 = vadd.f32 %v3138_v53, %v4022_v38  ;;  %v813_v56 = vpop.f32.mrb[23].mxu0  ;;  %3175 = vmatmul.mubr.msk.f32.gmra.mrb[16].mxu1 %vm984_vm5, %v4112_v54  ;;  %3421 = vmatprep.subr.bf16.mxu0 %v3582_v47 }
 0x18d   :  { %v960_v57 = vmul.f32 %v4030_v50, %v928_v52  ;;  %v910_v59 = vadd.f32 %v4022_v38, %v813_v56  ;;  %3177 = vmatprep.mubr.msk.f32.mxu1 %vm3581_vm3, %v3580_v36  ;;  %vm944_vm14 = vcmp.ge.f32.partialorder %v928_v52, 0.0 }
 0x18f   :  { %v929_v60 = vmax.f32 %v910_v59, %v911_v55  ;;  %v3141_v61 = vpop.f32.mrb[24].mxu0  ;;  %v4121_v62 = vsel %vm944_vm14, %v928_v52, %v960_v57 }
 0x190   :  { %v913_v63 = vadd.f32 %v3141_v61, %v4022_v38  ;;  %v823_v0 = vpop.f32.mrb[25].mxu0  ;;  %3178 = vmatmul.mubr.msk.f32.gmra.mrb[18].mxu1 %vm984_vm5, %v4121_v62 }
 0x191   :  { %v961_v2 = vmul.f32 %v4030_v50, %v929_v60  ;;  %v912_v3 = vadd.f32 %v4022_v38, %v823_v0  ;;  %3180 = vmatprep.mubr.msk.f32.mxu1 %vm3581_vm3, %v3580_v36  ;;  %vm945_vm15 = vcmp.ge.f32.partialorder %v929_v60, 0.0 }
 0x193   :  { %v930_v4 = vmax.f32 %v912_v3, %v913_v63  ;;  %v3144_v5 = vpop.f32.mrb[26].mxu0  ;;  %v4130_v6 = vsel %vm945_vm15, %v929_v60, %v961_v2 }
 0x194   :  { %v915_v7 = vadd.f32 %v3144_v5, %v4022_v38  ;;  %v833_v9 = vpop.f32.mrb[27].mxu0  ;;  %3181 = vmatmul.mubr.msk.f32.gmra.mrb[20].mxu1 %vm984_vm5, %v4130_v6 }
 0x195   :  { %v962_v10 = vmul.f32 %v4030_v50, %v930_v4  ;;  %v914_v11 = vadd.f32 %v4022_v38, %v833_v9  ;;  %3183 = vmatprep.mubr.msk.f32.mxu1 %vm3581_vm3, %v3580_v36  ;;  %vm946_vm0 = vcmp.ge.f32.partialorder %v930_v4, 0.0 }
 0x197   :  { %v931_v12 = vmax.f32 %v914_v11, %v915_v7  ;;  %v3147_v13 = vpop.f32.mrb[28].mxu0  ;;  %v4139_v14 = vsel %vm946_vm0, %v930_v4, %v962_v10 }
 0x198   :  { %v917_v16 = vadd.f32 %v3147_v13, %v4022_v38  ;;  %v843_v17 = vpop.f32.mrb[29].mxu0  ;;  %3184 = vmatmul.mubr.msk.f32.gmra.mrb[22].mxu1 %vm984_vm5, %v4139_v14 }
 0x199   :  { %v963_v18 = vmul.f32 %v4030_v50, %v931_v12  ;;  %v916_v19 = vadd.f32 %v4022_v38, %v843_v17  ;;  %3186 = vmatprep.mubr.msk.f32.mxu1 %vm3581_vm3, %v3580_v36  ;;  %vm947_vm1 = vcmp.ge.f32.partialorder %v931_v12, 0.0  ;;  %v2741_v38 = vld [vmem:[%s4537_s3 + $0x8] sm:$0xf] }
 0x19b   :  { %v932_v21 = vmax.f32 %v916_v19, %v917_v16  ;;  %v978_v23 = vsel %vm947_vm1, %v931_v12, %v963_v18 }
 0x19c   :  { %3187 = vmatmul.mubr.msk.f32.gmra.mrb[24].mxu1 %vm984_vm5, %v978_v23 }
 0x19d   :  { %v964_v24 = vmul.f32 %v4030_v50, %v932_v21  ;;  %3191 = vmatprep.mubr.msk.f32.mxu1 %vm3581_vm3, %v3580_v36  ;;  %vm948_vm6 = vcmp.ge.f32.partialorder %v932_v21, 0.0 }
 0x19f   :  { %v979_v26 = vsel %vm948_vm6, %v932_v21, %v964_v24 }
 0x1a0   :  { %3192 = vmatmul.mubr.msk.f32.vlgmr.msra.gmra.mrb[26].mxu1 %vm984_vm5, %v965_v25 }
 0x1a1   :  { %3231 = vmatpush3.msk.msra.mxu1 %vm1024_vm2, %v2741_v38  ;;  %3194 = vmatprep.mubr.msk.f32.mxu1 %vm3581_vm3, %v3580_v36 }
 0x1a2   :  { %3271 = vmatprep.subr.mxu1 %v2758_v43 }
 0x1a4   :  { %3195 = vmatmul.mubr.msk.f32.gmra.mrb[28].mxu1 %vm984_vm5, %v4038_v58 }
 0x1a5   :  { %3197 = vmatprep.mubr.msk.f32.mxu1 %vm3581_vm3, %v3580_v36 }
 0x1a8   :  { %3198 = vmatmul.mubr.msk.f32.gmra.mrb[30].mxu1 %vm984_vm5, %v4049_v1 }
 0x1a9   :  { %3200 = vmatprep.mubr.msk.f32.mxu1 %vm3581_vm3, %v3580_v36 }
 0x1ac   :  { %3201 = vmatmul.mubr.msk.f32.gmra.mrb[32].mxu1 %vm984_vm5, %v4058_v8 }
 0x1ad   :  { %3203 = vmatprep.mubr.msk.f32.mxu1 %vm3581_vm3, %v3580_v36 }
 0x1b0   :  { %3204 = vmatmul.mubr.msk.f32.gmra.mrb[34].mxu1 %vm984_vm5, %v4067_v15 }
 0x1b1   :  { %3206 = vmatprep.mubr.msk.f32.mxu1 %vm3581_vm3, %v3580_v36 }
 0x1b4   :  { %3207 = vmatmul.mubr.msk.f32.gmra.mrb[36].mxu1 %vm984_vm5, %v4076_v22 }
 0x1b5   :  { %3209 = vmatprep.mubr.msk.f32.mxu1 %vm3581_vm3, %v3580_v36 }
 0x1b8   :  { %3210 = vmatmul.mubr.msk.f32.gmra.mrb[38].mxu1 %vm984_vm5, %v4085_v29 }
 0x1b9   :  { %3212 = vmatprep.mubr.msk.f32.mxu1 %vm3581_vm3, %v3580_v36 }
 0x1bc   :  { %3213 = vmatmul.mubr.msk.f32.gmra.mrb[40].mxu1 %vm984_vm5, %v4094_v37 }
 0x1bd   :  { %3215 = vmatprep.mubr.msk.f32.mxu1 %vm3581_vm3, %v3580_v36 }
 0x1c0   :  { %3216 = vmatmul.mubr.msk.f32.gmra.mrb[42].mxu1 %vm984_vm5, %v4103_v46 }
 0x1c1   :  { %3218 = vmatprep.mubr.msk.f32.mxu1 %vm3581_vm3, %v3580_v36 }
 0x1c4   :  { %3219 = vmatmul.mubr.msk.f32.gmra.mrb[44].mxu1 %vm984_vm5, %v4112_v54 }
 0x1c5   :  { %3221 = vmatprep.mubr.msk.f32.mxu1 %vm3581_vm3, %v3580_v36 }
 0x1c8   :  { %3222 = vmatmul.mubr.msk.f32.gmra.mrb[46].mxu1 %vm984_vm5, %v4121_v62 }
 0x1c9   :  { %3224 = vmatprep.mubr.msk.f32.mxu1 %vm3581_vm3, %v3580_v36 }
 0x1cc   :  { %3225 = vmatmul.mubr.msk.f32.gmra.mrb[48].mxu1 %vm984_vm5, %v4130_v6 }
 0x1cd   :  { %3227 = vmatprep.mubr.msk.f32.mxu1 %vm3581_vm3, %v3580_v36 }
 0x1d0   :  { %3228 = vmatmul.mubr.msk.f32.gmra.mrb[50].mxu1 %vm984_vm5, %v4139_v14 }
 0x1d1   :  { %3232 = vmatprep.mubr.msk.f32.mxu1 %vm3581_vm3, %v3580_v36 }
 0x1d4   :  { %3233 = vmatmul.mubr.msk.f32.vlgmr.msra.gmra.mrb[52].mxu1 %vm984_vm5, %v4049_v1 }
 0x1d5   :  { %3235 = vmatprep.mubr.msk.f32.mxu1 %vm3581_vm3, %v3580_v36  ;;  %3272 = vmatpush3.msra.mxu1 %v2758_v43 }
 0x1d6   :  { %3279 = vmatprep.subr.mxu1 %v4265_v31 }
 0x1d8   :  { %3236 = vmatmul.mubr.msk.f32.gmra.mrb[54].mxu1 %vm984_vm5, %v4058_v8 }
 0x1d9   :  { %3238 = vmatprep.mubr.msk.f32.mxu1 %vm3581_vm3, %v3580_v36 }
 0x1dc   :  { %3239 = vmatmul.mubr.msk.f32.gmra.mrb[56].mxu1 %vm984_vm5, %v4067_v15 }
 0x1dd   :  { %3241 = vmatprep.mubr.msk.f32.mxu1 %vm3581_vm3, %v3580_v36 }
 0x1e0   :  { %3242 = vmatmul.mubr.msk.f32.gmra.mrb[58].mxu1 %vm984_vm5, %v4076_v22 }
 0x1e1   :  { %3244 = vmatprep.mubr.msk.f32.mxu1 %vm3581_vm3, %v3580_v36 }
 0x1e4   :  { %3245 = vmatmul.mubr.msk.f32.gmra.mrb[60].mxu1 %vm984_vm5, %v4085_v29 }
 0x1e5   :  { %3247 = vmatprep.mubr.msk.f32.mxu1 %vm3581_vm3, %v3580_v36 }
 0x1e8   :  { %3248 = vmatmul.mubr.msk.f32.gmra.mrb[62].mxu1 %vm984_vm5, %v4094_v37 }
 0x1e9   :  { %3250 = vmatprep.mubr.msk.f32.mxu1 %vm3581_vm3, %v3580_v36 }
 0x1ec   :  { %3251 = vmatmul.mubr.msk.f32.gmra.mrb[64].mxu1 %vm984_vm5, %v4103_v46  ;;  %v2775_v46 = vld [vmem:[%s4542_s8 + $0x18] sm:$0xff] }
 0x1ed   :  { %3253 = vmatprep.mubr.msk.f32.mxu1 %vm3581_vm3, %v3580_v36  ;;  %v3422_v48 = vpack.c.bf16 %v2775_v46, %v2774_v45 }
 0x1ef   :  { %3423 = vmatpush3.bf16.msra.mxu0 %v3422_v48 }
 0x1f0   :  { %3254 = vmatmul.mubr.msk.f32.gmra.mrb[66].mxu1 %vm984_vm5, %v4112_v54  ;;  %3427 = vmatprep.subr.bf16.mxu0 %v3582_v47 }
 0x1f1   :  { %3256 = vmatprep.mubr.msk.f32.mxu1 %vm3581_vm3, %v3580_v36 }
 0x1f4   :  { %3257 = vmatmul.mubr.msk.f32.gmra.mrb[68].mxu1 %vm984_vm5, %v4121_v62 }
 0x1f5   :  { %3259 = vmatprep.mubr.msk.f32.mxu1 %vm3581_vm3, %v3580_v36 }
 0x1f8   :  { %3260 = vmatmul.mubr.msk.f32.gmra.mrb[70].mxu1 %vm984_vm5, %v4130_v6 }
 0x1f9   :  { %3262 = vmatprep.mubr.msk.f32.mxu1 %vm3581_vm3, %v3580_v36 }
 0x1fc   :  { %3263 = vmatmul.mubr.msk.f32.gmra.mrb[72].mxu1 %vm984_vm5, %v4139_v14 }
 0x1fd   :  { %3265 = vmatprep.mubr.msk.f32.mxu1 %vm3581_vm3, %v3580_v36 }
 0x200   :  { %3266 = vmatmul.mubr.msk.f32.gmra.mrb[74].mxu1 %vm984_vm5, %v978_v23 }
 0x201   :  { %3268 = vmatprep.mubr.msk.f32.mxu1 %vm3581_vm3, %v3580_v36 }
 0x204   :  { %3269 = vmatmul.mubr.msk.f32.gmra.mrb[76].mxu1 %vm984_vm5, %v979_v26  ;;  %vm1489_vm5 = vcmask 64512  }
 0x23f   :  { %v1094_v50 = vpop.f32.mrb[0].mxu1 }
 0x240   :  { %v3152_v58 = vpop.f32.mrb[1].mxu1 }
 0x243   :  { %v1099_v1 = vpop.f32.mrb[2].mxu1 }
 0x244   :  { %v3155_v8 = vpop.f32.mrb[3].mxu1 }
 0x247   :  { %v1104_v15 = vpop.f32.mrb[4].mxu1 }
 0x248   :  { %v3158_v22 = vpop.f32.mrb[5].mxu1 }
 0x24b   :  { %v1109_v27 = vpop.f32.mrb[6].mxu1 }
 0x24c   :  { %v3161_v28 = vpop.f32.mrb[7].mxu1 }
 0x24f   :  { %v1114_v29 = vpop.f32.mrb[8].mxu1 }
 0x250   :  { %v3164_v30 = vpop.f32.mrb[9].mxu1 }
 0x251   :  { %v4287_v30 = vld [vmem:[%s4538_s4] ss:$0 sm:$0xff] }
 0x253   :  { %v1119_v32 = vpop.f32.mrb[10].mxu1 }
 0x254   :  { %v3167_v33 = vpop.f32.mrb[11].mxu1 }
 0x257   :  { %v1124_v34 = vpop.f32.mrb[12].mxu1 }
 0x258   :  { %v3170_v35 = vpop.f32.mrb[13].mxu1 }
 0x25b   :  { %v1129_v37 = vpop.f32.mrb[14].mxu1 }
 0x25c   :  { %v3173_v39 = vpop.f32.mrb[15].mxu1 }
 0x25f   :  { %v1134_v40 = vpop.f32.mrb[16].mxu1 }
 0x260   :  { %v3176_v41 = vpop.f32.mrb[17].mxu1 }
 0x263   :  { %v1139_v42 = vpop.f32.mrb[18].mxu1 }
 0x264   :  { %v3179_v44 = vpop.f32.mrb[19].mxu1 }
 0x267   :  { %v1144_v49 = vpop.f32.mrb[20].mxu1 }
 0x268   :  { %v3182_v51 = vpop.f32.mrb[21].mxu1 }
 0x26b   :  { %v1149_v52 = vpop.f32.mrb[22].mxu1 }
 0x26c   :  { %v3185_v53 = vpop.f32.mrb[23].mxu1 }
 0x26f   :  { %v1154_v54 = vpop.f32.mrb[24].mxu1 }
 0x270   :  { %v3188_v55 = vpop.f32.mrb[25].mxu1 }
 0x271   :  { %v4295_v55 = vstv %s2757_s28 }
 0x273   :  { %v1229_v56 = vpop.f32.mrb[26].mxu1 }
 0x274   :  { %v1230_v57 = vadd.f32 %v1229_v56, %v1094_v50  ;;  %v3193_v59 = vpop.f32.mrb[27].mxu1 }
 0x277   :  { %v1234_v60 = vpop.f32.mrb[28].mxu1 }
 0x278   :  { %v1235_v61 = vadd.f32 %v1234_v60, %v1099_v1  ;;  %v3196_v62 = vpop.f32.mrb[29].mxu1 }
 0x27b   :  { %v1239_v63 = vpop.f32.mrb[30].mxu1 }
 0x27c   :  { %v1240_v0 = vadd.f32 %v1239_v63, %v1104_v15  ;;  %v3199_v2 = vpop.f32.mrb[31].mxu1 }
 0x27f   :  { %v1244_v3 = vpop.f32.mrb[32].mxu1 }
 0x280   :  { %v1245_v4 = vadd.f32 %v1244_v3, %v1109_v27  ;;  %v3202_v5 = vpop.f32.mrb[33].mxu1 }
 0x283   :  { %v1249_v6 = vpop.f32.mrb[34].mxu1 }
 0x284   :  { %v1250_v7 = vadd.f32 %v1249_v6, %v1114_v29  ;;  %v3205_v9 = vpop.f32.mrb[35].mxu1 }
 0x287   :  { %v1254_v10 = vpop.f32.mrb[36].mxu1 }
 0x288   :  { %v1255_v11 = vadd.f32 %v1254_v10, %v1119_v32  ;;  %v3208_v12 = vpop.f32.mrb[37].mxu1 }
 0x28b   :  { %v1259_v13 = vpop.f32.mrb[38].mxu1 }
 0x28c   :  { %v1260_v14 = vadd.f32 %v1259_v13, %v1124_v34  ;;  %v3211_v16 = vpop.f32.mrb[39].mxu1 }
 0x28f   :  { %v1264_v17 = vpop.f32.mrb[40].mxu1 }
 0x290   :  { %v1265_v18 = vadd.f32 %v1264_v17, %v1129_v37  ;;  %v3214_v19 = vpop.f32.mrb[41].mxu1 }
 0x293   :  { %v1269_v20 = vpop.f32.mrb[42].mxu1 }
 0x294   :  { %v4276_v21 = vadd.f32 %v1269_v20, %v1134_v40  ;;  %v3217_v23 = vpop.f32.mrb[43].mxu1 }
 0x297   :  { %v1274_v24 = vpop.f32.mrb[44].mxu1 }
 0x298   :  { %v4278_v38 = vadd.f32 %v1274_v24, %v1139_v42  ;;  %v3220_v25 = vpop.f32.mrb[45].mxu1 }
 0x29b   :  { %v1279_v26 = vpop.f32.mrb[46].mxu1 }
 0x29c   :  { %v4280_v43 = vadd.f32 %v1279_v26, %v1144_v49  ;;  %v3223_v50 = vpop.f32.mrb[47].mxu1 }
 0x29f   :  { %v1284_v58 = vpop.f32.mrb[48].mxu1 }
 0x2a0   :  { %v4282_v1 = vadd.f32 %v1284_v58, %v1149_v52  ;;  %v3226_v8 = vpop.f32.mrb[49].mxu1 }
 0x2a3   :  { %v1289_v15 = vpop.f32.mrb[50].mxu1 }
 0x2a4   :  { %v3229_v22 = vpop.f32.mrb[51].mxu1 }
 0x2a7   :  { %v1366_v27 = vpop.f32.mrb[52].mxu1 }
 0x2a8   :  { %v1429_v28 = vadd.f32 %v1366_v27, %v1230_v57  ;;  %v3234_v29 = vpop.f32.mrb[53].mxu1 }
 0x2aa   :  { %v1447_v35 = vadd.f32 %v4287_v30, %v1429_v28 }
 0x2ab   :  { %v1371_v32 = vpop.f32.mrb[54].mxu1 }
 0x2ac   :  { %v1430_v33 = vadd.f32 %v1371_v32, %v1235_v61  ;;  %v3237_v34 = vpop.f32.mrb[55].mxu1 }
 0x2ae   :  { %v1448_v37 = vadd.f32 %v4287_v30, %v1430_v33 }
 0x2af   :  { %v1376_v39 = vpop.f32.mrb[56].mxu1 }
 0x2b0   :  { %v4291_v40 = vmax.f32 %v1447_v35, %v1448_v37  ;;  %v1431_v41 = vadd.f32 %v1376_v39, %v1240_v0  ;;  %v3240_v42 = vpop.f32.mrb[57].mxu1  ;;  %v1793_v39 = vld [vmem:[%s4542_s8] sm:$0xff] }
 0x2b1   :  { %v2772_v42 = vld [vmem:[%s4540_s6] ss:$0 sm:$0xff] }
 0x2b2   :  { %v1449_v48 = vadd.f32 %v4287_v30, %v1431_v41  ;;  %v1473_v15 = vmul.f32 %v4295_v55, %v4291_v40  ;;  %vm1466_vm10 = vcmp.ge.f32.partialorder %v4291_v40, 0.0 }
 0x2b3   :  { %v1381_v44 = vpop.f32.mrb[58].mxu1 }
 0x2b4   :  { %v1432_v45 = vadd.f32 %v1381_v44, %v1245_v4  ;;  %v3243_v46 = vpop.f32.mrb[59].mxu1  ;;  %v1479_v32 = vsel %vm1466_vm10, %v4291_v40, %v1473_v15  ;;  %v1794_v40 = vld [vmem:[%s4542_s8 + $0x8] sm:$0xff] }
 0x2b5   :  { %v3425_v41 = vpack.c.bf16 %v1794_v40, %v1793_v39  ;;  %v2434_v39 = vld [vmem:[%s4544_s10 + $0x60] sm:$0xff]  ;;  %v2435_v40 = vld [vmem:[%s4544_s10 + $0x68] sm:$0xff] }
 0x2b6   :  { %v1450_v49 = vadd.f32 %v4287_v30, %v1432_v45 }
 0x2b7   :  { %v1386_v51 = vpop.f32.mrb[60].mxu1 }
 0x2b8   :  { %v1460_v52 = vmax.f32 %v1449_v48, %v1450_v49  ;;  %v1433_v53 = vadd.f32 %v1386_v51, %v1250_v7  ;;  %v3246_v54 = vpop.f32.mrb[61].mxu1  ;;  %v1784_v49 = vstv %s2773_s0 }
 0x2ba   :  { %vm1467_vm2 = vcmp.ge.f32.partialorder %v1460_v52, 0.0  ;;  %v1474_v56 = vmul.f32 %v4295_v55, %v1460_v52  ;;  %v1451_v62 = vadd.f32 %v4287_v30, %v1433_v53 }
 0x2bb   :  { %v1391_v57 = vpop.f32.mrb[62].mxu1 }
 0x2bc   :  { %v1434_v59 = vadd.f32 %v1391_v57, %v1255_v11  ;;  %v3249_v60 = vpop.f32.mrb[63].mxu1  ;;  %v1480_v61 = vsel %vm1467_vm2, %v1460_v52, %v1474_v56  ;;  %v2767_v11 = vld [vmem:[%s4539_s5 + $0x10] sm:$0xff] }
 0x2bd   :  { %3273 = vmatprep.mubr.msk.f32.mxu1 %vm1489_vm5, %v1480_v61 }
 0x2be   :  { %v1452_v63 = vadd.f32 %v4287_v30, %v1434_v59 }
 0x2bf   :  { %v1396_v0 = vpop.f32.mrb[64].mxu1 }
 0x2c0   :  { %v1461_v2 = vmax.f32 %v1451_v62, %v1452_v63  ;;  %v1435_v3 = vadd.f32 %v1396_v0, %v1260_v14  ;;  %v3252_v4 = vpop.f32.mrb[65].mxu1  ;;  %v2779_v62 = vld [vmem:[%s4542_s8 + $0x28] sm:$0xff]  ;;  %v2781_v63 = vld [vmem:[%s4542_s8 + $0x30] sm:$0xff]  ;;  %v2782_v0 = vld [vmem:[%s4542_s8 + $0x38] sm:$0xff] }
 0x2c1   :  { %v3431_v4 = vpack.c.bf16 %v2782_v0, %v2781_v63  ;;  %v2526_v0 = vld [vmem:[%s4546_s12 + $0x50] sm:$0xff] }
 0x2c2   :  { %vm1468_vm7 = vcmp.ge.f32.partialorder %v1461_v2, 0.0  ;;  %v1475_v5 = vmul.f32 %v4295_v55, %v1461_v2  ;;  %v1453_v12 = vadd.f32 %v4287_v30, %v1435_v3 }
 0x2c3   :  { %v1401_v6 = vpop.f32.mrb[66].mxu1 }
 0x2c4   :  { %v1436_v7 = vadd.f32 %v1401_v6, %v1265_v18  ;;  %v3255_v9 = vpop.f32.mrb[67].mxu1  ;;  %v1481_v10 = vsel %vm1468_vm7, %v1461_v2, %v1475_v5  ;;  %v2784_v5 = vld [vmem:[%s4542_s8 + $0x40] sm:$0xff]  ;;  %v2785_v6 = vld [vmem:[%s4542_s8 + $0x48] sm:$0xff] }
 0x2c5   :  { %3274 = vmatmul.mubr.msk.f32.vlgmr.msra.gmra.mrb[78].mxu1 %vm1489_vm5, %v1481_v10  ;;  %v2788_v9 = vld [vmem:[%s4542_s8 + $0x58] sm:$0xff] }
 0x2c6   :  { %v1454_v13 = vadd.f32 %v4287_v30, %v1436_v7  ;;  %3280 = vmatpush3.msra.mxu1 %v4265_v31  ;;  %v2787_v7 = vld [vmem:[%s4542_s8 + $0x50] sm:$0xff] }
 0x2c7   :  { %v1406_v14 = vpop.f32.mrb[68].mxu1  ;;  %3287 = vmatprep.subr.mxu1 %v2767_v11 }
 0x2c8   :  { %v1462_v16 = vmax.f32 %v1453_v12, %v1454_v13  ;;  %v1437_v17 = vadd.f32 %v1406_v14, %v4276_v21  ;;  %v3258_v18 = vpop.f32.mrb[69].mxu1  ;;  %v3434_v12 = vpack.c.bf16 %v2785_v6, %v2784_v5  ;;  %v3437_v13 = vpack.c.bf16 %v2788_v9, %v2787_v7  ;;  %v2790_v14 = vld [vmem:[%s4542_s8 + $0x60] sm:$0xff]  ;;  %v2529_v5 = vld [vmem:[%s4546_s12 + $0x68] sm:$0xff] }
 0x2c9   :  { %v2794_v18 = vld [vmem:[%s4542_s8 + $0x78] sm:$0xff] }
 0x2ca   :  { %vm1469_vm8 = vcmp.ge.f32.partialorder %v1462_v16, 0.0  ;;  %v1476_v19 = vmul.f32 %v4295_v55, %v1462_v16  ;;  %v1455_v26 = vadd.f32 %v4287_v30, %v1437_v17  ;;  %v2793_v17 = vld [vmem:[%s4542_s8 + $0x70] sm:$0xff] }
 0x2cb   :  { %v1411_v20 = vpop.f32.mrb[70].mxu1 }
 0x2cc   :  { %v1438_v23 = vadd.f32 %v1411_v20, %v4278_v38  ;;  %v3261_v24 = vpop.f32.mrb[71].mxu1  ;;  %v1482_v25 = vsel %vm1469_vm8, %v1462_v16, %v1476_v19  ;;  %v2791_v16 = vld [vmem:[%s4542_s8 + $0x68] sm:$0xff] }
 0x2cd   :  { %3276 = vmatprep.mubr.msk.f32.mxu1 %vm1489_vm5, %v1482_v25  ;;  %v3443_v24 = vpack.c.bf16 %v2794_v18, %v2793_v17 }
 0x2ce   :  { %v1456_v31 = vadd.f32 %v4287_v30, %v1438_v23  ;;  %v3440_v23 = vpack.c.bf16 %v2791_v16, %v2790_v14 }
 0x2cf   :  { %v1416_v50 = vpop.f32.mrb[72].mxu1 }
 0x2d0   :  { %v1463_v58 = vmax.f32 %v1455_v26, %v1456_v31  ;;  %v1439_v8 = vadd.f32 %v1416_v50, %v4280_v43  ;;  %v3264_v21 = vpop.f32.mrb[73].mxu1  ;;  %v2423_v26 = vld [vmem:[%s4544_s10 + $0x8] sm:$0xff] }
 0x2d1   :  { %v2425_v21 = vld [vmem:[%s4544_s10 + $0x18] sm:$0xff] }
 0x2d2   :  { %vm1470_vm9 = vcmp.ge.f32.partialorder %v1463_v58, 0.0  ;;  %v1477_v22 = vmul.f32 %v4295_v55, %v1463_v58  ;;  %v1457_v43 = vadd.f32 %v4287_v30, %v1439_v8  ;;  %v2424_v8 = vld [vmem:[%s4544_s10 + $0x10] sm:$0xff] }
 0x2d3   :  { %v1421_v38 = vpop.f32.mrb[74].mxu1 }
 0x2d4   :  { %v1440_v27 = vadd.f32 %v1421_v38, %v4282_v1  ;;  %v3267_v28 = vpop.f32.mrb[75].mxu1  ;;  %v1483_v29 = vsel %vm1470_vm9, %v1463_v58, %v1477_v22  ;;  %v3449_v38 = vpack.c.bf16 %v2425_v21, %v2424_v8 }
 0x2d5   :  { %3277 = vmatmul.mubr.msk.f32.gmra.mrb[80].mxu1 %vm1489_vm5, %v1483_v29  ;;  %v2427_v28 = vld [vmem:[%s4544_s10 + $0x28] sm:$0xff] }
 0x2d6   :  { %v1458_v33 = vadd.f32 %v4287_v30, %v1440_v27  ;;  %3281 = vmatprep.mubr.msk.f32.mxu1 %vm1489_vm5, %v1479_v32  ;;  %v2426_v27 = vld [vmem:[%s4544_s10 + $0x20] sm:$0xff]  ;;  %v2428_v32 = vld [vmem:[%s4544_s10 + $0x30] sm:$0xff] }
 0x2d7   :  { %v1426_v34 = vpop.f32.mrb[76].mxu1 }
 0x2d8   :  { %v1464_v35 = vmax.f32 %v1457_v43, %v1458_v33  ;;  %v3270_v37 = vpop.f32.mrb[77].mxu1  ;;  %v2429_v43 = vld [vmem:[%s4544_s10 + $0x38] sm:$0xff]  ;;  %v2431_v34 = vld [vmem:[%s4544_s10 + $0x48] sm:$0xff] }
 0x2d9   :  { %3282 = vmatmul.mubr.msk.f32.vlgmr.msra.gmra.mrb[78].mxu1 %vm1489_vm5, %v1480_v61  ;;  %v2778_v61 = vld [vmem:[%s4542_s8 + $0x20] sm:$0xff]  ;;  %v3455_v33 = vpack.c.bf16 %v2429_v43, %v2428_v32  ;;  %v2432_v37 = vld [vmem:[%s4544_s10 + $0x50] sm:$0xff] }
 0x2da   :  { %3284 = vmatprep.mubr.msk.f32.mxu1 %vm1489_vm5, %v1481_v10  ;;  %3288 = vmatpush3.msra.mxu1 %v2767_v11  ;;  %v1478_v1 = vmul.f32 %v4295_v55, %v1464_v35  ;;  %vm1471_vm11 = vcmp.ge.f32.partialorder %v1464_v35, 0.0  ;;  %v3428_v3 = vpack.c.bf16 %v2779_v62, %v2778_v61  ;;  %v2524_v61 = vld [vmem:[%s4546_s12 + $0x40] sm:$0xff]  ;;  %v2525_v62 = vld [vmem:[%s4546_s12 + $0x48] sm:$0xff] }
 0x2db   :  { %3424 = vmatprep.subr.bf16.mxu1 %v3582_v47  ;;  %v3482_v63 = vpack.c.bf16 %v2525_v62, %v2524_v61  ;;  %v2797_v43 = vld [vmem:[%s4545_s11] ss:$0 sm:$0xff] }
 0x2dc   :  { %v1484_v30 = vsel %vm1471_vm11, %v1464_v35, %v1478_v1  ;;  %v2433_v1 = vld [vmem:[%s4544_s10 + $0x58] sm:$0xff] }
 0x2dd   :  { %3285 = vmatmul.mubr.msk.f32.gmra.mrb[80].mxu1 %vm1489_vm5, %v1482_v25 }
 0x2de   :  { %3289 = vmatprep.mubr.msk.f32.mxu1 %vm1489_vm5, %v1481_v10 }
 0x2e1   :  { %3290 = vmatmul.mubr.msk.f32.vlgmr.msra.gmra.mrb[78].mxu1 %vm1489_vm5, %v1482_v25  ;;  %v2422_v25 = vld [vmem:[%s4544_s10] sm:$0xff] }
 0x2e2   :  { %3292 = vmatprep.mubr.msk.f32.mxu1 %vm1489_vm5, %v1483_v29  ;;  %3426 = vmatpush3.bf16.msra.mxu1 %v3425_v41  ;;  %v3446_v58 = vpack.c.bf16 %v2423_v26, %v2422_v25  ;;  %v3452_v29 = vpack.c.bf16 %v2427_v28, %v2426_v27  ;;  %v3464_v41 = vpack.c.bf16 %v2435_v40, %v2434_v39  ;;  %v2530_v28 = vld [vmem:[%s4546_s12 + $0x70] sm:$0xff] }
 0x2e3   :  { %3430 = vmatprep.subr.bf16.mxu1 %v3582_v47 }
 0x2e5   :  { %3293 = vmatmul.mubr.msk.f32.gmra.mrb[80].mxu1 %vm1489_vm5, %v1484_v30  ;;  %v3461_v30 = vpack.c.bf16 %v2433_v1, %v2432_v37  ;;  %v2798_v37 = vld [vmem:[#allocation3] ss:$0 sm:$0xff] }
 0x2e6   :  { %3306 = vmatprep.mubr.msk.f32.mxu1 %vm3581_vm3, %v3580_v36 }
 0x3b4   :  { %v3291_v44 = vpop.f32.mrb[78].mxu1 }
 0x3b5   :  { %v1776_v45 = vadd.f32 %v3291_v44, %v2772_v42  ;;  %v1746_v46 = vpop.f32.mrb[79].mxu1  ;;  %v2437_v44 = vld [vmem:[%s4544_s10 + $0x78] sm:$0xff] }
 0x3b6   :  { %v1775_v48 = vadd.f32 %v2772_v42, %v1746_v46  ;;  %v2516_v46 = vld [vmem:[%s4546_s12] sm:$0xff] }
 0x3b8   :  { %v1779_v51 = vmax.f32 %v1775_v48, %v1776_v45  ;;  %v3294_v52 = vpop.f32.mrb[80].mxu1  ;;  %v2517_v48 = vld [vmem:[%s4546_s12 + $0x8] sm:$0xff] }
 0x3b9   :  { %v1778_v53 = vadd.f32 %v3294_v52, %v2772_v42  ;;  %v1756_v54 = vpop.f32.mrb[81].mxu1  ;;  %v2519_v52 = vld [vmem:[%s4546_s12 + $0x18] sm:$0xff] }
 0x3ba   :  { %vm1782_vm12 = vcmp.ge.f32.partialorder %v1779_v51, 0.0  ;;  %v1785_v55 = vmul.f32 %v1784_v49, %v1779_v51  ;;  %v1777_v56 = vadd.f32 %v2772_v42, %v1756_v54  ;;  %v2436_v42 = vld [vmem:[%s4544_s10 + $0x70] sm:$0xff]  ;;  %v2520_v54 = vld [vmem:[%s4546_s12 + $0x20] sm:$0xff] }
 0x3bb   :  { %v3467_v45 = vpack.c.bf16 %v2437_v44, %v2436_v42 }
 0x3bc   :  { %v1787_v57 = vsel %vm1782_vm12, %v1779_v51, %v1785_v55  ;;  %v1780_v59 = vmax.f32 %v1777_v56, %v1778_v53  ;;  %v3470_v51 = vpack.c.bf16 %v2517_v48, %v2516_v46  ;;  %v2521_v55 = vld [vmem:[%s4546_s12 + $0x28] sm:$0xff] }
 0x3bd   :  { %1790 = vst.msk [vmem:[#allocation2] sm:$0xff] %vm1789_vm13, %v1787_v57  ;;  %v3476_v56 = vpack.c.bf16 %v2521_v55, %v2520_v54  ;;  %v2522_v57 = vld [vmem:[%s4546_s12 + $0x30] sm:$0xff] }
 0x3be   :  { %vm1783_vm14 = vcmp.ge.f32.partialorder %v1780_v59, 0.0  ;;  %v1786_v60 = vmul.f32 %v1784_v49, %v1780_v59  ;;  %v2518_v49 = vld [vmem:[%s4546_s12 + $0x10] sm:$0xff] }
 0x3bf   :  { %v3473_v53 = vpack.c.bf16 %v2519_v52, %v2518_v49 }
 0x3c0   :  { %v1788_v2 = vsel %vm1783_vm14, %v1780_v59, %v1786_v60  ;;  %v2523_v59 = vld [vmem:[%s4546_s12 + $0x38] sm:$0xff] }
 0x3c1   :  { %1791 = vst.msk [vmem:[#allocation2 + $0x8] sm:$0xff] %vm1789_vm13, %v1788_v2  ;;  %v3479_v60 = vpack.c.bf16 %v2523_v59, %v2522_v57  ;;  %v2527_v2 = vld [vmem:[%s4546_s12 + $0x58] sm:$0xff] }
 0x3c4   :  { %v1795_v10 = vld [vmem:[#allocation2 + $0x2] sm:$0x3]  ;;  %v1792_v11 = vld [vmem:[#allocation2] sm:$0x3]  ;;  %v1945_v19 = vld [vmem:[#allocation2 + $0x4] sm:$0x3] }
 0x3c5   :  { %3300 = vmatmul.mubr.msk.f32.vlgmr.msra.gmra.mrb[30].mxu0 %vm1789_vm13, %v1795_v10  ;;  %3307 = vmatmul.mubr.msk.f32.vlgmr.msra.gmra.mrb[82].mxu1 %vm1789_vm13, %v1792_v11  ;;  %v2023_v20 = vld [vmem:[#allocation2 + $0x6] sm:$0x3] }
 0x3c6   :  { %3429 = vmatpush3.bf16.msra.mxu0 %v3428_v3  ;;  %3432 = vmatpush3.bf16.msra.mxu1 %v3431_v4  ;;  %v3485_v3 = vpack.c.bf16 %v2527_v2, %v2526_v0  ;;  %v2528_v4 = vld [vmem:[%s4546_s12 + $0x60] sm:$0xff] }
 0x3c7   :  { %3313 = vmatprep.mubr.msk.f32.mxu0 %vm3581_vm3, %v3580_v36  ;;  %3320 = vmatprep.mubr.msk.f32.mxu1 %vm3581_vm3, %v3580_v36  ;;  %v3488_v6 = vpack.c.bf16 %v2529_v5, %v2528_v4 }
 0x3c8   :  { %3433 = vmatprep.subr.bf16.mxu0 %v3582_v47  ;;  %3436 = vmatprep.subr.bf16.mxu1 %v3582_v47  ;;  %v2101_v31 = vld [vmem:[#allocation2 + $0x8] sm:$0x3]  ;;  %v2179_v50 = vld [vmem:[#allocation2 + $0xa] sm:$0x3]  ;;  %v2257_v15 = vld [vmem:[#allocation2 + $0xc] sm:$0x3] }
 0x3c9   :  { %3314 = vmatmul.mubr.msk.f32.vlgmr.msra.gmra.mrb[32].mxu0 %vm1789_vm13, %v1945_v19  ;;  %3321 = vmatmul.mubr.msk.f32.vlgmr.msra.gmra.mrb[84].mxu1 %vm1789_vm13, %v2023_v20  ;;  %v2335_v22 = vld [vmem:[#allocation2 + $0xe] sm:$0x3] }
 0x3ca   :  { %3435 = vmatpush3.bf16.msra.mxu0 %v3434_v12  ;;  %3438 = vmatpush3.bf16.msra.mxu1 %v3437_v13 }
 0x3cb   :  { %3327 = vmatprep.mubr.msk.f32.mxu0 %vm3581_vm3, %v3580_v36  ;;  %3334 = vmatprep.mubr.msk.f32.mxu1 %vm3581_vm3, %v3580_v36 }
 0x3cc   :  { %3439 = vmatprep.subr.bf16.mxu0 %v3582_v47  ;;  %3442 = vmatprep.subr.bf16.mxu1 %v3582_v47 }
 0x3cd   :  { %3328 = vmatmul.mubr.msk.f32.vlgmr.msra.gmra.mrb[34].mxu0 %vm1789_vm13, %v2101_v31  ;;  %3335 = vmatmul.mubr.msk.f32.vlgmr.msra.gmra.mrb[86].mxu1 %vm1789_vm13, %v2179_v50 }
 0x3ce   :  { %3441 = vmatpush3.bf16.msra.mxu0 %v3440_v23  ;;  %3444 = vmatpush3.bf16.msra.mxu1 %v3443_v24 }
 0x3cf   :  { %3341 = vmatprep.mubr.msk.f32.mxu0 %vm3581_vm3, %v3580_v36  ;;  %3348 = vmatprep.mubr.msk.f32.mxu1 %vm3581_vm3, %v3580_v36 }
 0x3d0   :  { %3445 = vmatprep.subr.bf16.mxu0 %v3582_v47  ;;  %3469 = vmatprep.subr.bf16.mxu1 %v3582_v47 }
 0x3d1   :  { %3342 = vmatmul.mubr.msk.f32.vlgmr.msra.gmra.mrb[36].mxu0 %vm1789_vm13, %v2257_v15  ;;  %3349 = vmatmul.mubr.msk.f32.vlgmr.msra.gmra.mrb[88].mxu1 %vm1789_vm13, %v2335_v22  ;;  %v2796_v15 = vld [vmem:[%s4543_s9] ss:$0 sm:$0xff] }
 0x3d2   :  { %3447 = vmatpush3.bf16.msra.mxu0 %v3446_v58  ;;  %3383 = vmatprep.mubr.msk.f32.mxu0 %vm3581_vm3, %v3580_v36 }
 0x3d3   :  { %3448 = vmatprep.subr.bf16.mxu0 %v3582_v47  ;;  %3418 = vmatprep.mubr.msk.f32.mxu1 %vm3581_vm3, %v3580_v36  ;;  %v2430_v36 = vld [vmem:[%s4544_s10 + $0x40] sm:$0xff]  ;;  %vm2609_vm3 = vcmask 1024  }
 0x3d4   :  { %v3458_v35 = vpack.c.bf16 %v2431_v34, %v2430_v36  ;;  %3471 = vmatpush3.bf16.msra.mxu1 %v3470_v51 }
 0x3d5   :  { %3472 = vmatprep.subr.bf16.mxu1 %v3582_v47 }
 0x3d6   :  { %3450 = vmatpush3.bf16.msra.mxu0 %v3449_v38 }
 0x3d7   :  { %3451 = vmatprep.subr.bf16.mxu0 %v3582_v47 }
 0x3d8   :  { %3474 = vmatpush3.bf16.msra.mxu1 %v3473_v53 }
 0x3d9   :  { %3475 = vmatprep.subr.bf16.mxu1 %v3582_v47 }
 0x3da   :  { %3453 = vmatpush3.bf16.msra.mxu0 %v3452_v29  ;;  %v2531_v29 = vld [vmem:[%s4546_s12 + $0x78] sm:$0xff] }
 0x3db   :  { %3454 = vmatprep.subr.bf16.mxu0 %v3582_v47  ;;  %v3491_v32 = vpack.c.bf16 %v2531_v29, %v2530_v28 }
 0x3dc   :  { %3477 = vmatpush3.bf16.msra.mxu1 %v3476_v56 }
 0x3dd   :  { %3478 = vmatprep.subr.bf16.mxu1 %v3582_v47 }
 0x3de   :  { %3456 = vmatpush3.bf16.msra.mxu0 %v3455_v33 }
 0x3df   :  { %3457 = vmatprep.subr.bf16.mxu0 %v3582_v47 }
 0x3e0   :  { %3480 = vmatpush3.bf16.msra.mxu1 %v3479_v60 }
 0x3e1   :  { %3481 = vmatprep.subr.bf16.mxu1 %v3582_v47 }
 0x3e2   :  { %3459 = vmatpush3.bf16.msra.mxu0 %v3458_v35 }
 0x3e3   :  { %3460 = vmatprep.subr.bf16.mxu0 %v3582_v47 }
 0x3e4   :  { %3483 = vmatpush3.bf16.msra.mxu1 %v3482_v63 }
 0x3e5   :  { %3484 = vmatprep.subr.bf16.mxu1 %v3582_v47 }
 0x3e6   :  { %3462 = vmatpush3.bf16.msra.mxu0 %v3461_v30 }
 0x3e7   :  { %3463 = vmatprep.subr.bf16.mxu0 %v3582_v47 }
 0x3e8   :  { %3486 = vmatpush3.bf16.msra.mxu1 %v3485_v3 }
 0x3e9   :  { %3487 = vmatprep.subr.bf16.mxu1 %v3582_v47 }
 0x3ea   :  { %3465 = vmatpush3.bf16.msra.mxu0 %v3464_v41 }
 0x3eb   :  { %3466 = vmatprep.subr.bf16.mxu0 %v3582_v47 }
 0x3ec   :  { %3489 = vmatpush3.bf16.msra.mxu1 %v3488_v6 }
 0x3ed   :  { %3490 = vmatprep.subr.bf16.mxu1 %v3582_v47 }
 0x3ee   :  { %3468 = vmatpush3.bf16.msra.mxu0 %v3467_v45 }
 0x3f0   :  { %3492 = vmatpush3.bf16.msra.mxu1 %v3491_v32 }
 0x498   :  { %v1868_v7 = vpop.f32.mrb[30].mxu0  ;;  %v1941_v9 = vpop.f32.mrb[82].mxu1 }
 0x499   :  { %v1942_v10 = vadd.f32 %v1941_v9, %v1868_v7  ;;  %v3301_v11 = vpop.f32.mrb[31].mxu0  ;;  %v3308_v12 = vpop.f32.mrb[83].mxu1 }
 0x49c   :  { %v2018_v13 = vpop.f32.mrb[32].mxu0  ;;  %v2096_v14 = vpop.f32.mrb[84].mxu1 }
 0x49d   :  { %v2022_v16 = vadd.f32 %v2018_v13, %v1942_v10  ;;  %v3315_v17 = vpop.f32.mrb[33].mxu0  ;;  %v3322_v18 = vpop.f32.mrb[85].mxu1 }
 0x49f   :  { %v2100_v19 = vadd.f32 %v2096_v14, %v2022_v16 }
 0x4a0   :  { %v2174_v20 = vpop.f32.mrb[34].mxu0  ;;  %v2252_v23 = vpop.f32.mrb[86].mxu1 }
 0x4a1   :  { %v2178_v24 = vadd.f32 %v2174_v20, %v2100_v19  ;;  %v3329_v25 = vpop.f32.mrb[35].mxu0  ;;  %v3336_v26 = vpop.f32.mrb[87].mxu1 }
 0x4a3   :  { %v2256_v31 = vadd.f32 %v2252_v23, %v2178_v24 }
 0x4a4   :  { %v2330_v50 = vpop.f32.mrb[36].mxu0  ;;  %v2408_v58 = vpop.f32.mrb[88].mxu1 }
 0x4a5   :  { %v2334_v47 = vadd.f32 %v2330_v50, %v2256_v31  ;;  %v3343_v8 = vpop.f32.mrb[37].mxu0  ;;  %v3350_v21 = vpop.f32.mrb[89].mxu1 }
 0x4a7   :  { %v2412_v22 = vadd.f32 %v2408_v58, %v2334_v47 }
 0x4a9   :  { %v2420_v38 = vadd.f32 %v2796_v15, %v2412_v22 }
 0x4ab   :  { %v2421_v27 = vmax.f32 %v2420_v38, 0.0 }
 0x4ad   :  { %3384 = vmatmul.mubr.f32.vlgmr.msra.gmra.mrb[38].mxu0 %v2421_v27 }
 0x580   :  { %v2511_v33 = vpop.f32.mrb[38].mxu0 }
 0x581   :  { %v2512_v36 = vadd.f32 %v2797_v43, %v2511_v33  ;;  %v3385_v34 = vpop.f32.mrb[39].mxu0 }
 0x583   :  { %v2515_v35 = vmax.f32 %v2512_v36, 0.0 }
 0x585   :  { %3419 = vmatmul.mubr.f32.vlgmr.msra.gmra.mrb[90].mxu1 %v2515_v35 }
 0x658   :  { %v2605_v1 = vpop.f32.mrb[90].mxu1 }
 0x659   :  { %v2606_v30 = vadd.f32 %v2798_v37, %v2605_v1  ;;  %v3420_v39 = vpop.f32.mrb[91].mxu1 }
 0x65b   :  { %2610 = vst.msk [vmem:[%s4548_s14] sm:$0x3] %vm2609_vm3, %v2606_v30 }
 0x65c   :  { %2615 = vsyncpa [#allocation5], 1 }

</bundles_post_ra>
